<compile_context>
chip_gen: v7x
topology: tpu7x:2x2x1
jax: 0.10.0
libtpu: 0.0.40
codegen_flags: <defaults>
</compile_context>

<pallas_src>
import numpy as np
import jax
import jax.numpy as jnp
from jax.experimental import pallas as pl
from jax.experimental.pallas import tpu as pltpu


def _round_up(x, m):
    return (x + m - 1) // m * m


def _cores_per_chip():
    """2 TensorCores per JAX device on v7x / megacore chips, else 1 (v5e/v6e)."""
    try:
        kind = jax.devices()[0].device_kind.lower()
    except Exception:
        return 1
    if any(tag in kind for tag in ("v7", "7x", "v4", "v5p")):
        return 2
    return 1


def _build_gather_kernel(dims, col_h, n_cols):
    H, K, L = dims

    def kernel(hkl_ref, tbl_ref, out_ref):
        # hkl_ref: (3, TQ)   int32  raw h/k/l query rows (lane-dense)
        # tbl_ref: (CH, 128) int32  flat (miller_id + 1) table, column-major
        #                           chunks: tbl[s, c] = flat[c*CH + s]; pad = 0
        # out_ref: (1, TQ)   int32  gathered miller ids (lane-dense store)
        h = hkl_ref[0:1, :]
        k = hkl_ref[1:2, :]
        l = hkl_ref[2:3, :]
        # numpy negative-index wrap + bounds check (folded in from the wrapper)
        h = jnp.where(h < 0, h + H, h)
        k = jnp.where(k < 0, k + K, k)
        l = jnp.where(l < 0, l + L, l)
        valid = (h >= 0) & (h < H) & (k >= 0) & (k < K) & (l >= 0) & (l < L)
        idx = (h * K + k) * L + l                       # (1, TQ) flat index
        idx = jnp.where(valid, idx, -1)                 # OOB -> never hits -> -1
        tq = idx.shape[1]

        # Hoisted broadcast (JAX does not CSE broadcast_in_dim inside loops).
        idx_b = jnp.broadcast_to(idx, (col_h, tq))      # (CH, TQ)
        sub = jax.lax.broadcasted_iota(jnp.int32, (col_h, 1), 0)

        # Chunked gather over the used table columns: per-iteration
        # intermediates are only (CH, TQ), so the chain streams (no spills).
        acc = jnp.zeros((8, tq), jnp.int32)
        for c in range(n_cols):
            pos = sub + c * col_h                       # (CH, 1) flat positions
            hit = idx_b == pos                          # (CH, TQ) one-hot slice
            contrib = jnp.where(hit, tbl_ref[:, c:c + 1], 0)
            for j in range(col_h // 8):                 # fold CH -> 8 sublanes
                acc = acc + contrib[j * 8:(j + 1) * 8, :]
        # Single final sublane reduction -> lane-dense (1, TQ) unmasked store.
        # Table stores value+1, so a miss (sum 0) becomes -1 here.
        out_ref[...] = jnp.sum(acc, axis=0, keepdims=True) - 1

    return kernel


class ReciprocalASUPallas:
    """Synthetic, deterministic ReciprocalASU (P1-like) with a Pallas forward."""

    MAX_TQ = 2048   # queries (lanes) per grid step
    MIN_TQ = 256    # query-tile granularity

    def __init__(self, hmax=(4, 3, 2), anomalous=False):
        # TODO(synk): rs.utils / gemmi spacegroup machinery is unavailable here;
        # we deterministically emulate spacegroup P1 (identity op + Friedel mates).
        hm, km, lm = hmax
        self.hmax = hmax
        H, K, L = 2 * hm + 1, 2 * km + 1, 2 * lm + 1
        self.dims = (H, K, L)

        grid_hkl = np.stack(
            np.meshgrid(np.arange(-hm, hm + 1),
                        np.arange(-km, km + 1),
                        np.arange(-lm, lm + 1),
                        indexing="ij"),
            axis=-1).reshape(-1, 3)

        def in_asu(v):
            h, k, l = int(v[0]), int(v[1]), int(v[2])
            if (h, k, l) == (0, 0, 0):
                return False
            if l != 0:
                return l > 0
            if k != 0:
                return k > 0
            return h > 0

        Hasu = np.array([v for v in grid_hkl if in_asu(v)], dtype=np.int64)
        self.Hasu = Hasu
        self.asu_size = len(Hasu)

        # non-trainable buffers analogous to the torch module (unused in forward)
        self.centric = np.zeros(self.asu_size, dtype=bool)
        self.multiplicity = np.ones(self.asu_size, dtype=np.float32)

        # miller_id table, filled exactly like the torch __init__ (identity op
        # + Friedel mates since anomalous=False); negative indices wrap.
        miller_id = -np.ones((H, K, L), dtype=np.int32)
        h, k, l = Hasu.T
        miller_id[h, k, l] = np.arange(self.asu_size)
        if not anomalous:
            h, k, l = (-Hasu).T
            miller_id[h, k, l] = np.arange(self.asu_size)
        self.miller_id = miller_id  # (H, K, L) int32, the forward's buffer

        # Compact flat-table layout: column-major (CH, 128) chunks, one VMEM
        # lane tile (~T*4 bytes) instead of a 128x lane-padded (T_pad, 1)
        # column.  Values are stored as miller_id + 1 (pad/miss = 0) so the
        # kernel's one-hot sum maps "no hit" to -1.
        T = H * K * L
        self._col_h = _round_up(max(1, pl.cdiv(T, 128)), 8)
        self._n_cols = pl.cdiv(T, self._col_h)           # <= 128 used columns
        padded = np.zeros(self._col_h * 128, dtype=np.int32)
        padded[:T] = miller_id.reshape(-1) + 1
        self._table = jnp.asarray(padded.reshape(128, self._col_h).T)

        self._cores_per_chip = _cores_per_chip()
        self._kernel = _build_gather_kernel(self.dims, self._col_h, self._n_cols)

    # ------------------------------------------------------------------ #
    def _choose_tile(self, n):
        n_eff = max(int(n), 1)
        n_min = _round_up(n_eff, self.MIN_TQ)
        if self._cores_per_chip >= 2 and n_min >= 2 * self.MIN_TQ:
            # v7x / megacore: >= 2 "parallel" grid steps so both TCs get work.
            tq = min(self.MAX_TQ, _round_up(pl.cdiv(n_min, 2), self.MIN_TQ))
        else:
            # Single TensorCore (v5e/v6e): one grid step whenever it fits,
            # avoiding the ~0.35us per-step pipeline overhead.
            tq = min(self.MAX_TQ, n_min)
        return tq, _round_up(n_eff, tq)

    # ------------------------------------------------------------------ #
    def __call__(self, hkl):
        hkl = jnp.asarray(hkl, dtype=jnp.int32)
        lead_shape = hkl.shape[:-1]
        flat = hkl.reshape(-1, 3)
        N = flat.shape[0]
        TQ, N_pad = self._choose_tile(N)

        # Lane-dense (3, N_pad) query stream; wrap/flatten happens in-kernel.
        # Padded lanes are (0,0,0) -> they gather miller_id[0,0,0] = -1 and are
        # sliced off below.
        q = jnp.pad(flat.T, ((0, 0), (0, N_pad - N)))

        out = pl.pallas_call(
            self._kernel,
            out_shape=jax.ShapeDtypeStruct((1, N_pad), jnp.int32),
            grid_spec=pltpu.PrefetchScalarGridSpec(
                num_scalar_prefetch=0,
                grid=(N_pad // TQ,),
                in_specs=[
                    pl.BlockSpec((3, TQ), lambda i: (0, i)),
                    pl.BlockSpec((self._col_h, 128), lambda i: (0, 0)),
                ],
                out_specs=pl.BlockSpec((1, TQ), lambda i: (0, i)),
            ),
            compiler_params=pltpu.CompilerParams(
                dimension_semantics=("parallel",)),
        )(q, self._table)
        return out[0, :N].reshape(lead_shape)


if __name__ == "__main__":
    hmax = (4, 3, 2)
    asu = ReciprocalASUPallas(hmax=hmax, anomalous=False)

    lo = jnp.array([-hmax[0], -hmax[1], -hmax[2]], dtype=jnp.int32)
    hi = jnp.array([hmax[0] + 1, hmax[1] + 1, hmax[2] + 1], dtype=jnp.int32)

    # deterministic small query batch of Miller indices in [-hmax, hmax]
    key = jax.random.PRNGKey(0)
    k1, k2 = jax.random.split(key)
    hkl_small = jax.random.randint(k1, (2, 8, 3), minval=lo, maxval=hi, dtype=jnp.int32)
    # larger batch -> exercises the single-step (v5e/v6e) / multi-step (v7x) path
    hkl_big = jax.random.randint(k2, (4, 300, 3), minval=lo, maxval=hi, dtype=jnp.int32)

    for hkl in (hkl_small, hkl_big):
        out = jax.block_until_ready(asu(hkl))
        hkl_np = np.asarray(hkl)
        ref = asu.miller_id[hkl_np[..., 0], hkl_np[..., 1], hkl_np[..., 2]]
        assert out.shape == ref.shape, (out.shape, ref.shape)
        assert out.dtype == jnp.int32
        np.testing.assert_array_equal(np.asarray(out), ref)

    # out-of-range queries (torch/numpy indexing would raise) now return -1
    H = 2 * hmax[0] + 1
    hkl_oob = jnp.array([[H, 0, 0], [-H - 1, 0, 0], [1, 0, 0]], dtype=jnp.int32)
    out_oob = np.asarray(jax.block_until_ready(asu(hkl_oob)))
    assert out_oob[0] == -1 and out_oob[1] == -1
    assert out_oob[2] == asu.miller_id[1, 0, 0]

    print("KERNEL_OK")
</pallas_src>

<mosaic_0001>
module attributes {stable_mosaic.version = 11 : i64} {
  func.func @kernel(%arg0: i32, %arg1: memref<3x256xi32, #tpu.memory_space<vmem>>, %arg2: memref<8x128xi32, #tpu.memory_space<vmem>>, %arg3: memref<1x256xi32, #tpu.memory_space<vmem>>) attributes {dimension_semantics = [#tpu.dimension_semantics<parallel>], iteration_bounds = array<i64: 1>, scalar_prefetch = 0 : i64, scratch_operands = 0 : i64, tpu.core_type = #tpu.core_type<tc>, window_params = [{transform_indices = @transform_0, window_bounds = array<i64: 3, 256>}, {pipeline_mode = #tpu.pipeline_mode<synchronous>, transform_indices = @transform_1, window_bounds = array<i64: 8, 128>}, {transform_indices = @transform_2, window_bounds = array<i64: 1, 256>}]} {
    %c0 = arith.constant 0 : index
    %c0_0 = arith.constant 0 : index
    %0 = vector.load %arg1[%c0, %c0_0] : memref<3x256xi32, #tpu.memory_space<vmem>>, vector<1x256xi32>
    %c1 = arith.constant 1 : index
    %c0_1 = arith.constant 0 : index
    %1 = vector.load %arg1[%c1, %c0_1] : memref<3x256xi32, #tpu.memory_space<vmem>>, vector<1x256xi32>
    %c2 = arith.constant 2 : index
    %c0_2 = arith.constant 0 : index
    %2 = vector.load %arg1[%c2, %c0_2] : memref<3x256xi32, #tpu.memory_space<vmem>>, vector<1x256xi32>
    %c0_i32 = arith.constant 0 : i32
    %3 = vector.broadcast %c0_i32 : i32 to vector<1x256xi32>
    %4 = arith.cmpi slt, %0, %3 : vector<1x256xi32>
    %c9_i32 = arith.constant 9 : i32
    %5 = vector.broadcast %c9_i32 : i32 to vector<1x256xi32>
    %6 = arith.addi %0, %5 : vector<1x256xi32>
    %7 = arith.select %4, %6, %0 : vector<1x256xi1>, vector<1x256xi32>
    %c0_i32_3 = arith.constant 0 : i32
    %8 = vector.broadcast %c0_i32_3 : i32 to vector<1x256xi32>
    %9 = arith.cmpi slt, %1, %8 : vector<1x256xi32>
    %c7_i32 = arith.constant 7 : i32
    %10 = vector.broadcast %c7_i32 : i32 to vector<1x256xi32>
    %11 = arith.addi %1, %10 : vector<1x256xi32>
    %12 = arith.select %9, %11, %1 : vector<1x256xi1>, vector<1x256xi32>
    %c0_i32_4 = arith.constant 0 : i32
    %13 = vector.broadcast %c0_i32_4 : i32 to vector<1x256xi32>
    %14 = arith.cmpi slt, %2, %13 : vector<1x256xi32>
    %c5_i32 = arith.constant 5 : i32
    %15 = vector.broadcast %c5_i32 : i32 to vector<1x256xi32>
    %16 = arith.addi %2, %15 : vector<1x256xi32>
    %17 = arith.select %14, %16, %2 : vector<1x256xi1>, vector<1x256xi32>
    %c0_i32_5 = arith.constant 0 : i32
    %18 = vector.broadcast %c0_i32_5 : i32 to vector<1x256xi32>
    %19 = arith.cmpi sge, %7, %18 : vector<1x256xi32>
    %c9_i32_6 = arith.constant 9 : i32
    %20 = vector.broadcast %c9_i32_6 : i32 to vector<1x256xi32>
    %21 = arith.cmpi slt, %7, %20 : vector<1x256xi32>
    %22 = arith.andi %19, %21 : vector<1x256xi1>
    %c0_i32_7 = arith.constant 0 : i32
    %23 = vector.broadcast %c0_i32_7 : i32 to vector<1x256xi32>
    %24 = arith.cmpi sge, %12, %23 : vector<1x256xi32>
    %25 = arith.andi %22, %24 : vector<1x256xi1>
    %c7_i32_8 = arith.constant 7 : i32
    %26 = vector.broadcast %c7_i32_8 : i32 to vector<1x256xi32>
    %27 = arith.cmpi slt, %12, %26 : vector<1x256xi32>
    %28 = arith.andi %25, %27 : vector<1x256xi1>
    %c0_i32_9 = arith.constant 0 : i32
    %29 = vector.broadcast %c0_i32_9 : i32 to vector<1x256xi32>
    %30 = arith.cmpi sge, %17, %29 : vector<1x256xi32>
    %31 = arith.andi %28, %30 : vector<1x256xi1>
    %c5_i32_10 = arith.constant 5 : i32
    %32 = vector.broadcast %c5_i32_10 : i32 to vector<1x256xi32>
    %33 = arith.cmpi slt, %17, %32 : vector<1x256xi32>
    %34 = arith.andi %31, %33 : vector<1x256xi1>
    %c7_i32_11 = arith.constant 7 : i32
    %35 = vector.broadcast %c7_i32_11 : i32 to vector<1x256xi32>
    %36 = arith.muli %7, %35 : vector<1x256xi32>
    %37 = arith.addi %36, %12 : vector<1x256xi32>
    %c5_i32_12 = arith.constant 5 : i32
    %38 = vector.broadcast %c5_i32_12 : i32 to vector<1x256xi32>
    %39 = arith.muli %37, %38 : vector<1x256xi32>
    %40 = arith.addi %39, %17 : vector<1x256xi32>
    %c-1_i32 = arith.constant -1 : i32
    %41 = vector.broadcast %c-1_i32 : i32 to vector<1x256xi32>
    %42 = arith.select %34, %40, %41 : vector<1x256xi1>, vector<1x256xi32>
    %43 = vector.shape_cast %42 : vector<1x256xi32> to vector<1x256xi32>
    %44 = vector.broadcast %43 : vector<1x256xi32> to vector<8x256xi32>
    %45 = tpu.iota {dimensions = array<i32: 0>} : vector<8x1xi32>
    %c0_i32_13 = arith.constant 0 : i32
    %46 = vector.broadcast %c0_i32_13 : i32 to vector<8x256xi32>
    %c0_i32_14 = arith.constant 0 : i32
    %47 = vector.broadcast %c0_i32_14 : i32 to vector<8x1xi32>
    %48 = arith.addi %45, %47 : vector<8x1xi32>
    %49 = vector.broadcast %48 : vector<8x1xi32> to vector<8x256xi32>
    %50 = arith.cmpi eq, %44, %49 : vector<8x256xi32>
    %c0_15 = arith.constant 0 : index
    %c0_16 = arith.constant 0 : index
    %51 = vector.load %arg2[%c0_15, %c0_16] : memref<8x128xi32, #tpu.memory_space<vmem>>, vector<8x1xi32>
    %c0_i32_17 = arith.constant 0 : i32
    %52 = vector.shape_cast %51 : vector<8x1xi32> to vector<8x1xi32>
    %53 = vector.broadcast %52 : vector<8x1xi32> to vector<8x256xi32>
    %54 = vector.broadcast %c0_i32_17 : i32 to vector<8x256xi32>
    %55 = arith.select %50, %53, %54 : vector<8x256xi1>, vector<8x256xi32>
    %56 = arith.addi %46, %55 : vector<8x256xi32>
    %c8_i32 = arith.constant 8 : i32
    %57 = vector.broadcast %c8_i32 : i32 to vector<8x1xi32>
    %58 = arith.addi %45, %57 : vector<8x1xi32>
    %59 = vector.broadcast %58 : vector<8x1xi32> to vector<8x256xi32>
    %60 = arith.cmpi eq, %44, %59 : vector<8x256xi32>
    %c0_18 = arith.constant 0 : index
    %c1_19 = arith.constant 1 : index
    %61 = vector.load %arg2[%c0_18, %c1_19] : memref<8x128xi32, #tpu.memory_space<vmem>>, vector<8x1xi32>
    %c0_i32_20 = arith.constant 0 : i32
    %62 = vector.shape_cast %61 : vector<8x1xi32> to vector<8x1xi32>
    %63 = vector.broadcast %62 : vector<8x1xi32> to vector<8x256xi32>
    %64 = vector.broadcast %c0_i32_20 : i32 to vector<8x256xi32>
    %65 = arith.select %60, %63, %64 : vector<8x256xi1>, vector<8x256xi32>
    %66 = arith.addi %56, %65 : vector<8x256xi32>
    %c16_i32 = arith.constant 16 : i32
    %67 = vector.broadcast %c16_i32 : i32 to vector<8x1xi32>
    %68 = arith.addi %45, %67 : vector<8x1xi32>
    %69 = vector.broadcast %68 : vector<8x1xi32> to vector<8x256xi32>
    %70 = arith.cmpi eq, %44, %69 : vector<8x256xi32>
    %c0_21 = arith.constant 0 : index
    %c2_22 = arith.constant 2 : index
    %71 = vector.load %arg2[%c0_21, %c2_22] : memref<8x128xi32, #tpu.memory_space<vmem>>, vector<8x1xi32>
    %c0_i32_23 = arith.constant 0 : i32
    %72 = vector.shape_cast %71 : vector<8x1xi32> to vector<8x1xi32>
    %73 = vector.broadcast %72 : vector<8x1xi32> to vector<8x256xi32>
    %74 = vector.broadcast %c0_i32_23 : i32 to vector<8x256xi32>
    %75 = arith.select %70, %73, %74 : vector<8x256xi1>, vector<8x256xi32>
    %76 = arith.addi %66, %75 : vector<8x256xi32>
    %c24_i32 = arith.constant 24 : i32
    %77 = vector.broadcast %c24_i32 : i32 to vector<8x1xi32>
    %78 = arith.addi %45, %77 : vector<8x1xi32>
    %79 = vector.broadcast %78 : vector<8x1xi32> to vector<8x256xi32>
    %80 = arith.cmpi eq, %44, %79 : vector<8x256xi32>
    %c0_24 = arith.constant 0 : index
    %c3 = arith.constant 3 : index
    %81 = vector.load %arg2[%c0_24, %c3] : memref<8x128xi32, #tpu.memory_space<vmem>>, vector<8x1xi32>
    %c0_i32_25 = arith.constant 0 : i32
    %82 = vector.shape_cast %81 : vector<8x1xi32> to vector<8x1xi32>
    %83 = vector.broadcast %82 : vector<8x1xi32> to vector<8x256xi32>
    %84 = vector.broadcast %c0_i32_25 : i32 to vector<8x256xi32>
    %85 = arith.select %80, %83, %84 : vector<8x256xi1>, vector<8x256xi32>
    %86 = arith.addi %76, %85 : vector<8x256xi32>
    %c32_i32 = arith.constant 32 : i32
    %87 = vector.broadcast %c32_i32 : i32 to vector<8x1xi32>
    %88 = arith.addi %45, %87 : vector<8x1xi32>
    %89 = vector.broadcast %88 : vector<8x1xi32> to vector<8x256xi32>
    %90 = arith.cmpi eq, %44, %89 : vector<8x256xi32>
    %c0_26 = arith.constant 0 : index
    %c4 = arith.constant 4 : index
    %91 = vector.load %arg2[%c0_26, %c4] : memref<8x128xi32, #tpu.memory_space<vmem>>, vector<8x1xi32>
    %c0_i32_27 = arith.constant 0 : i32
    %92 = vector.shape_cast %91 : vector<8x1xi32> to vector<8x1xi32>
    %93 = vector.broadcast %92 : vector<8x1xi32> to vector<8x256xi32>
    %94 = vector.broadcast %c0_i32_27 : i32 to vector<8x256xi32>
    %95 = arith.select %90, %93, %94 : vector<8x256xi1>, vector<8x256xi32>
    %96 = arith.addi %86, %95 : vector<8x256xi32>
    %c40_i32 = arith.constant 40 : i32
    %97 = vector.broadcast %c40_i32 : i32 to vector<8x1xi32>
    %98 = arith.addi %45, %97 : vector<8x1xi32>
    %99 = vector.broadcast %98 : vector<8x1xi32> to vector<8x256xi32>
    %100 = arith.cmpi eq, %44, %99 : vector<8x256xi32>
    %c0_28 = arith.constant 0 : index
    %c5 = arith.constant 5 : index
    %101 = vector.load %arg2[%c0_28, %c5] : memref<8x128xi32, #tpu.memory_space<vmem>>, vector<8x1xi32>
    %c0_i32_29 = arith.constant 0 : i32
    %102 = vector.shape_cast %101 : vector<8x1xi32> to vector<8x1xi32>
    %103 = vector.broadcast %102 : vector<8x1xi32> to vector<8x256xi32>
    %104 = vector.broadcast %c0_i32_29 : i32 to vector<8x256xi32>
    %105 = arith.select %100, %103, %104 : vector<8x256xi1>, vector<8x256xi32>
    %106 = arith.addi %96, %105 : vector<8x256xi32>
    %c48_i32 = arith.constant 48 : i32
    %107 = vector.broadcast %c48_i32 : i32 to vector<8x1xi32>
    %108 = arith.addi %45, %107 : vector<8x1xi32>
    %109 = vector.broadcast %108 : vector<8x1xi32> to vector<8x256xi32>
    %110 = arith.cmpi eq, %44, %109 : vector<8x256xi32>
    %c0_30 = arith.constant 0 : index
    %c6 = arith.constant 6 : index
    %111 = vector.load %arg2[%c0_30, %c6] : memref<8x128xi32, #tpu.memory_space<vmem>>, vector<8x1xi32>
    %c0_i32_31 = arith.constant 0 : i32
    %112 = vector.shape_cast %111 : vector<8x1xi32> to vector<8x1xi32>
    %113 = vector.broadcast %112 : vector<8x1xi32> to vector<8x256xi32>
    %114 = vector.broadcast %c0_i32_31 : i32 to vector<8x256xi32>
    %115 = arith.select %110, %113, %114 : vector<8x256xi1>, vector<8x256xi32>
    %116 = arith.addi %106, %115 : vector<8x256xi32>
    %c56_i32 = arith.constant 56 : i32
    %117 = vector.broadcast %c56_i32 : i32 to vector<8x1xi32>
    %118 = arith.addi %45, %117 : vector<8x1xi32>
    %119 = vector.broadcast %118 : vector<8x1xi32> to vector<8x256xi32>
    %120 = arith.cmpi eq, %44, %119 : vector<8x256xi32>
    %c0_32 = arith.constant 0 : index
    %c7 = arith.constant 7 : index
    %121 = vector.load %arg2[%c0_32, %c7] : memref<8x128xi32, #tpu.memory_space<vmem>>, vector<8x1xi32>
    %c0_i32_33 = arith.constant 0 : i32
    %122 = vector.shape_cast %121 : vector<8x1xi32> to vector<8x1xi32>
    %123 = vector.broadcast %122 : vector<8x1xi32> to vector<8x256xi32>
    %124 = vector.broadcast %c0_i32_33 : i32 to vector<8x256xi32>
    %125 = arith.select %120, %123, %124 : vector<8x256xi1>, vector<8x256xi32>
    %126 = arith.addi %116, %125 : vector<8x256xi32>
    %c64_i32 = arith.constant 64 : i32
    %127 = vector.broadcast %c64_i32 : i32 to vector<8x1xi32>
    %128 = arith.addi %45, %127 : vector<8x1xi32>
    %129 = vector.broadcast %128 : vector<8x1xi32> to vector<8x256xi32>
    %130 = arith.cmpi eq, %44, %129 : vector<8x256xi32>
    %c0_34 = arith.constant 0 : index
    %c8 = arith.constant 8 : index
    %131 = vector.load %arg2[%c0_34, %c8] : memref<8x128xi32, #tpu.memory_space<vmem>>, vector<8x1xi32>
    %c0_i32_35 = arith.constant 0 : i32
    %132 = vector.shape_cast %131 : vector<8x1xi32> to vector<8x1xi32>
    %133 = vector.broadcast %132 : vector<8x1xi32> to vector<8x256xi32>
    %134 = vector.broadcast %c0_i32_35 : i32 to vector<8x256xi32>
    %135 = arith.select %130, %133, %134 : vector<8x256xi1>, vector<8x256xi32>
    %136 = arith.addi %126, %135 : vector<8x256xi32>
    %c72_i32 = arith.constant 72 : i32
    %137 = vector.broadcast %c72_i32 : i32 to vector<8x1xi32>
    %138 = arith.addi %45, %137 : vector<8x1xi32>
    %139 = vector.broadcast %138 : vector<8x1xi32> to vector<8x256xi32>
    %140 = arith.cmpi eq, %44, %139 : vector<8x256xi32>
    %c0_36 = arith.constant 0 : index
    %c9 = arith.constant 9 : index
    %141 = vector.load %arg2[%c0_36, %c9] : memref<8x128xi32, #tpu.memory_space<vmem>>, vector<8x1xi32>
    %c0_i32_37 = arith.constant 0 : i32
    %142 = vector.shape_cast %141 : vector<8x1xi32> to vector<8x1xi32>
    %143 = vector.broadcast %142 : vector<8x1xi32> to vector<8x256xi32>
    %144 = vector.broadcast %c0_i32_37 : i32 to vector<8x256xi32>
    %145 = arith.select %140, %143, %144 : vector<8x256xi1>, vector<8x256xi32>
    %146 = arith.addi %136, %145 : vector<8x256xi32>
    %c80_i32 = arith.constant 80 : i32
    %147 = vector.broadcast %c80_i32 : i32 to vector<8x1xi32>
    %148 = arith.addi %45, %147 : vector<8x1xi32>
    %149 = vector.broadcast %148 : vector<8x1xi32> to vector<8x256xi32>
    %150 = arith.cmpi eq, %44, %149 : vector<8x256xi32>
    %c0_38 = arith.constant 0 : index
    %c10 = arith.constant 10 : index
    %151 = vector.load %arg2[%c0_38, %c10] : memref<8x128xi32, #tpu.memory_space<vmem>>, vector<8x1xi32>
    %c0_i32_39 = arith.constant 0 : i32
    %152 = vector.shape_cast %151 : vector<8x1xi32> to vector<8x1xi32>
    %153 = vector.broadcast %152 : vector<8x1xi32> to vector<8x256xi32>
    %154 = vector.broadcast %c0_i32_39 : i32 to vector<8x256xi32>
    %155 = arith.select %150, %153, %154 : vector<8x256xi1>, vector<8x256xi32>
    %156 = arith.addi %146, %155 : vector<8x256xi32>
    %c88_i32 = arith.constant 88 : i32
    %157 = vector.broadcast %c88_i32 : i32 to vector<8x1xi32>
    %158 = arith.addi %45, %157 : vector<8x1xi32>
    %159 = vector.broadcast %158 : vector<8x1xi32> to vector<8x256xi32>
    %160 = arith.cmpi eq, %44, %159 : vector<8x256xi32>
    %c0_40 = arith.constant 0 : index
    %c11 = arith.constant 11 : index
    %161 = vector.load %arg2[%c0_40, %c11] : memref<8x128xi32, #tpu.memory_space<vmem>>, vector<8x1xi32>
    %c0_i32_41 = arith.constant 0 : i32
    %162 = vector.shape_cast %161 : vector<8x1xi32> to vector<8x1xi32>
    %163 = vector.broadcast %162 : vector<8x1xi32> to vector<8x256xi32>
    %164 = vector.broadcast %c0_i32_41 : i32 to vector<8x256xi32>
    %165 = arith.select %160, %163, %164 : vector<8x256xi1>, vector<8x256xi32>
    %166 = arith.addi %156, %165 : vector<8x256xi32>
    %c96_i32 = arith.constant 96 : i32
    %167 = vector.broadcast %c96_i32 : i32 to vector<8x1xi32>
    %168 = arith.addi %45, %167 : vector<8x1xi32>
    %169 = vector.broadcast %168 : vector<8x1xi32> to vector<8x256xi32>
    %170 = arith.cmpi eq, %44, %169 : vector<8x256xi32>
    %c0_42 = arith.constant 0 : index
    %c12 = arith.constant 12 : index
    %171 = vector.load %arg2[%c0_42, %c12] : memref<8x128xi32, #tpu.memory_space<vmem>>, vector<8x1xi32>
    %c0_i32_43 = arith.constant 0 : i32
    %172 = vector.shape_cast %171 : vector<8x1xi32> to vector<8x1xi32>
    %173 = vector.broadcast %172 : vector<8x1xi32> to vector<8x256xi32>
    %174 = vector.broadcast %c0_i32_43 : i32 to vector<8x256xi32>
    %175 = arith.select %170, %173, %174 : vector<8x256xi1>, vector<8x256xi32>
    %176 = arith.addi %166, %175 : vector<8x256xi32>
    %c104_i32 = arith.constant 104 : i32
    %177 = vector.broadcast %c104_i32 : i32 to vector<8x1xi32>
    %178 = arith.addi %45, %177 : vector<8x1xi32>
    %179 = vector.broadcast %178 : vector<8x1xi32> to vector<8x256xi32>
    %180 = arith.cmpi eq, %44, %179 : vector<8x256xi32>
    %c0_44 = arith.constant 0 : index
    %c13 = arith.constant 13 : index
    %181 = vector.load %arg2[%c0_44, %c13] : memref<8x128xi32, #tpu.memory_space<vmem>>, vector<8x1xi32>
    %c0_i32_45 = arith.constant 0 : i32
    %182 = vector.shape_cast %181 : vector<8x1xi32> to vector<8x1xi32>
    %183 = vector.broadcast %182 : vector<8x1xi32> to vector<8x256xi32>
    %184 = vector.broadcast %c0_i32_45 : i32 to vector<8x256xi32>
    %185 = arith.select %180, %183, %184 : vector<8x256xi1>, vector<8x256xi32>
    %186 = arith.addi %176, %185 : vector<8x256xi32>
    %c112_i32 = arith.constant 112 : i32
    %187 = vector.broadcast %c112_i32 : i32 to vector<8x1xi32>
    %188 = arith.addi %45, %187 : vector<8x1xi32>
    %189 = vector.broadcast %188 : vector<8x1xi32> to vector<8x256xi32>
    %190 = arith.cmpi eq, %44, %189 : vector<8x256xi32>
    %c0_46 = arith.constant 0 : index
    %c14 = arith.constant 14 : index
    %191 = vector.load %arg2[%c0_46, %c14] : memref<8x128xi32, #tpu.memory_space<vmem>>, vector<8x1xi32>
    %c0_i32_47 = arith.constant 0 : i32
    %192 = vector.shape_cast %191 : vector<8x1xi32> to vector<8x1xi32>
    %193 = vector.broadcast %192 : vector<8x1xi32> to vector<8x256xi32>
    %194 = vector.broadcast %c0_i32_47 : i32 to vector<8x256xi32>
    %195 = arith.select %190, %193, %194 : vector<8x256xi1>, vector<8x256xi32>
    %196 = arith.addi %186, %195 : vector<8x256xi32>
    %c120_i32 = arith.constant 120 : i32
    %197 = vector.broadcast %c120_i32 : i32 to vector<8x1xi32>
    %198 = arith.addi %45, %197 : vector<8x1xi32>
    %199 = vector.broadcast %198 : vector<8x1xi32> to vector<8x256xi32>
    %200 = arith.cmpi eq, %44, %199 : vector<8x256xi32>
    %c0_48 = arith.constant 0 : index
    %c15 = arith.constant 15 : index
    %201 = vector.load %arg2[%c0_48, %c15] : memref<8x128xi32, #tpu.memory_space<vmem>>, vector<8x1xi32>
    %c0_i32_49 = arith.constant 0 : i32
    %202 = vector.shape_cast %201 : vector<8x1xi32> to vector<8x1xi32>
    %203 = vector.broadcast %202 : vector<8x1xi32> to vector<8x256xi32>
    %204 = vector.broadcast %c0_i32_49 : i32 to vector<8x256xi32>
    %205 = arith.select %200, %203, %204 : vector<8x256xi1>, vector<8x256xi32>
    %206 = arith.addi %196, %205 : vector<8x256xi32>
    %c128_i32 = arith.constant 128 : i32
    %207 = vector.broadcast %c128_i32 : i32 to vector<8x1xi32>
    %208 = arith.addi %45, %207 : vector<8x1xi32>
    %209 = vector.broadcast %208 : vector<8x1xi32> to vector<8x256xi32>
    %210 = arith.cmpi eq, %44, %209 : vector<8x256xi32>
    %c0_50 = arith.constant 0 : index
    %c16 = arith.constant 16 : index
    %211 = vector.load %arg2[%c0_50, %c16] : memref<8x128xi32, #tpu.memory_space<vmem>>, vector<8x1xi32>
    %c0_i32_51 = arith.constant 0 : i32
    %212 = vector.shape_cast %211 : vector<8x1xi32> to vector<8x1xi32>
    %213 = vector.broadcast %212 : vector<8x1xi32> to vector<8x256xi32>
    %214 = vector.broadcast %c0_i32_51 : i32 to vector<8x256xi32>
    %215 = arith.select %210, %213, %214 : vector<8x256xi1>, vector<8x256xi32>
    %216 = arith.addi %206, %215 : vector<8x256xi32>
    %c136_i32 = arith.constant 136 : i32
    %217 = vector.broadcast %c136_i32 : i32 to vector<8x1xi32>
    %218 = arith.addi %45, %217 : vector<8x1xi32>
    %219 = vector.broadcast %218 : vector<8x1xi32> to vector<8x256xi32>
    %220 = arith.cmpi eq, %44, %219 : vector<8x256xi32>
    %c0_52 = arith.constant 0 : index
    %c17 = arith.constant 17 : index
    %221 = vector.load %arg2[%c0_52, %c17] : memref<8x128xi32, #tpu.memory_space<vmem>>, vector<8x1xi32>
    %c0_i32_53 = arith.constant 0 : i32
    %222 = vector.shape_cast %221 : vector<8x1xi32> to vector<8x1xi32>
    %223 = vector.broadcast %222 : vector<8x1xi32> to vector<8x256xi32>
    %224 = vector.broadcast %c0_i32_53 : i32 to vector<8x256xi32>
    %225 = arith.select %220, %223, %224 : vector<8x256xi1>, vector<8x256xi32>
    %226 = arith.addi %216, %225 : vector<8x256xi32>
    %c144_i32 = arith.constant 144 : i32
    %227 = vector.broadcast %c144_i32 : i32 to vector<8x1xi32>
    %228 = arith.addi %45, %227 : vector<8x1xi32>
    %229 = vector.broadcast %228 : vector<8x1xi32> to vector<8x256xi32>
    %230 = arith.cmpi eq, %44, %229 : vector<8x256xi32>
    %c0_54 = arith.constant 0 : index
    %c18 = arith.constant 18 : index
    %231 = vector.load %arg2[%c0_54, %c18] : memref<8x128xi32, #tpu.memory_space<vmem>>, vector<8x1xi32>
    %c0_i32_55 = arith.constant 0 : i32
    %232 = vector.shape_cast %231 : vector<8x1xi32> to vector<8x1xi32>
    %233 = vector.broadcast %232 : vector<8x1xi32> to vector<8x256xi32>
    %234 = vector.broadcast %c0_i32_55 : i32 to vector<8x256xi32>
    %235 = arith.select %230, %233, %234 : vector<8x256xi1>, vector<8x256xi32>
    %236 = arith.addi %226, %235 : vector<8x256xi32>
    %c152_i32 = arith.constant 152 : i32
    %237 = vector.broadcast %c152_i32 : i32 to vector<8x1xi32>
    %238 = arith.addi %45, %237 : vector<8x1xi32>
    %239 = vector.broadcast %238 : vector<8x1xi32> to vector<8x256xi32>
    %240 = arith.cmpi eq, %44, %239 : vector<8x256xi32>
    %c0_56 = arith.constant 0 : index
    %c19 = arith.constant 19 : index
    %241 = vector.load %arg2[%c0_56, %c19] : memref<8x128xi32, #tpu.memory_space<vmem>>, vector<8x1xi32>
    %c0_i32_57 = arith.constant 0 : i32
    %242 = vector.shape_cast %241 : vector<8x1xi32> to vector<8x1xi32>
    %243 = vector.broadcast %242 : vector<8x1xi32> to vector<8x256xi32>
    %244 = vector.broadcast %c0_i32_57 : i32 to vector<8x256xi32>
    %245 = arith.select %240, %243, %244 : vector<8x256xi1>, vector<8x256xi32>
    %246 = arith.addi %236, %245 : vector<8x256xi32>
    %c160_i32 = arith.constant 160 : i32
    %247 = vector.broadcast %c160_i32 : i32 to vector<8x1xi32>
    %248 = arith.addi %45, %247 : vector<8x1xi32>
    %249 = vector.broadcast %248 : vector<8x1xi32> to vector<8x256xi32>
    %250 = arith.cmpi eq, %44, %249 : vector<8x256xi32>
    %c0_58 = arith.constant 0 : index
    %c20 = arith.constant 20 : index
    %251 = vector.load %arg2[%c0_58, %c20] : memref<8x128xi32, #tpu.memory_space<vmem>>, vector<8x1xi32>
    %c0_i32_59 = arith.constant 0 : i32
    %252 = vector.shape_cast %251 : vector<8x1xi32> to vector<8x1xi32>
    %253 = vector.broadcast %252 : vector<8x1xi32> to vector<8x256xi32>
    %254 = vector.broadcast %c0_i32_59 : i32 to vector<8x256xi32>
    %255 = arith.select %250, %253, %254 : vector<8x256xi1>, vector<8x256xi32>
    %256 = arith.addi %246, %255 : vector<8x256xi32>
    %c168_i32 = arith.constant 168 : i32
    %257 = vector.broadcast %c168_i32 : i32 to vector<8x1xi32>
    %258 = arith.addi %45, %257 : vector<8x1xi32>
    %259 = vector.broadcast %258 : vector<8x1xi32> to vector<8x256xi32>
    %260 = arith.cmpi eq, %44, %259 : vector<8x256xi32>
    %c0_60 = arith.constant 0 : index
    %c21 = arith.constant 21 : index
    %261 = vector.load %arg2[%c0_60, %c21] : memref<8x128xi32, #tpu.memory_space<vmem>>, vector<8x1xi32>
    %c0_i32_61 = arith.constant 0 : i32
    %262 = vector.shape_cast %261 : vector<8x1xi32> to vector<8x1xi32>
    %263 = vector.broadcast %262 : vector<8x1xi32> to vector<8x256xi32>
    %264 = vector.broadcast %c0_i32_61 : i32 to vector<8x256xi32>
    %265 = arith.select %260, %263, %264 : vector<8x256xi1>, vector<8x256xi32>
    %266 = arith.addi %256, %265 : vector<8x256xi32>
    %c176_i32 = arith.constant 176 : i32
    %267 = vector.broadcast %c176_i32 : i32 to vector<8x1xi32>
    %268 = arith.addi %45, %267 : vector<8x1xi32>
    %269 = vector.broadcast %268 : vector<8x1xi32> to vector<8x256xi32>
    %270 = arith.cmpi eq, %44, %269 : vector<8x256xi32>
    %c0_62 = arith.constant 0 : index
    %c22 = arith.constant 22 : index
    %271 = vector.load %arg2[%c0_62, %c22] : memref<8x128xi32, #tpu.memory_space<vmem>>, vector<8x1xi32>
    %c0_i32_63 = arith.constant 0 : i32
    %272 = vector.shape_cast %271 : vector<8x1xi32> to vector<8x1xi32>
    %273 = vector.broadcast %272 : vector<8x1xi32> to vector<8x256xi32>
    %274 = vector.broadcast %c0_i32_63 : i32 to vector<8x256xi32>
    %275 = arith.select %270, %273, %274 : vector<8x256xi1>, vector<8x256xi32>
    %276 = arith.addi %266, %275 : vector<8x256xi32>
    %c184_i32 = arith.constant 184 : i32
    %277 = vector.broadcast %c184_i32 : i32 to vector<8x1xi32>
    %278 = arith.addi %45, %277 : vector<8x1xi32>
    %279 = vector.broadcast %278 : vector<8x1xi32> to vector<8x256xi32>
    %280 = arith.cmpi eq, %44, %279 : vector<8x256xi32>
    %c0_64 = arith.constant 0 : index
    %c23 = arith.constant 23 : index
    %281 = vector.load %arg2[%c0_64, %c23] : memref<8x128xi32, #tpu.memory_space<vmem>>, vector<8x1xi32>
    %c0_i32_65 = arith.constant 0 : i32
    %282 = vector.shape_cast %281 : vector<8x1xi32> to vector<8x1xi32>
    %283 = vector.broadcast %282 : vector<8x1xi32> to vector<8x256xi32>
    %284 = vector.broadcast %c0_i32_65 : i32 to vector<8x256xi32>
    %285 = arith.select %280, %283, %284 : vector<8x256xi1>, vector<8x256xi32>
    %286 = arith.addi %276, %285 : vector<8x256xi32>
    %c192_i32 = arith.constant 192 : i32
    %287 = vector.broadcast %c192_i32 : i32 to vector<8x1xi32>
    %288 = arith.addi %45, %287 : vector<8x1xi32>
    %289 = vector.broadcast %288 : vector<8x1xi32> to vector<8x256xi32>
    %290 = arith.cmpi eq, %44, %289 : vector<8x256xi32>
    %c0_66 = arith.constant 0 : index
    %c24 = arith.constant 24 : index
    %291 = vector.load %arg2[%c0_66, %c24] : memref<8x128xi32, #tpu.memory_space<vmem>>, vector<8x1xi32>
    %c0_i32_67 = arith.constant 0 : i32
    %292 = vector.shape_cast %291 : vector<8x1xi32> to vector<8x1xi32>
    %293 = vector.broadcast %292 : vector<8x1xi32> to vector<8x256xi32>
    %294 = vector.broadcast %c0_i32_67 : i32 to vector<8x256xi32>
    %295 = arith.select %290, %293, %294 : vector<8x256xi1>, vector<8x256xi32>
    %296 = arith.addi %286, %295 : vector<8x256xi32>
    %c200_i32 = arith.constant 200 : i32
    %297 = vector.broadcast %c200_i32 : i32 to vector<8x1xi32>
    %298 = arith.addi %45, %297 : vector<8x1xi32>
    %299 = vector.broadcast %298 : vector<8x1xi32> to vector<8x256xi32>
    %300 = arith.cmpi eq, %44, %299 : vector<8x256xi32>
    %c0_68 = arith.constant 0 : index
    %c25 = arith.constant 25 : index
    %301 = vector.load %arg2[%c0_68, %c25] : memref<8x128xi32, #tpu.memory_space<vmem>>, vector<8x1xi32>
    %c0_i32_69 = arith.constant 0 : i32
    %302 = vector.shape_cast %301 : vector<8x1xi32> to vector<8x1xi32>
    %303 = vector.broadcast %302 : vector<8x1xi32> to vector<8x256xi32>
    %304 = vector.broadcast %c0_i32_69 : i32 to vector<8x256xi32>
    %305 = arith.select %300, %303, %304 : vector<8x256xi1>, vector<8x256xi32>
    %306 = arith.addi %296, %305 : vector<8x256xi32>
    %c208_i32 = arith.constant 208 : i32
    %307 = vector.broadcast %c208_i32 : i32 to vector<8x1xi32>
    %308 = arith.addi %45, %307 : vector<8x1xi32>
    %309 = vector.broadcast %308 : vector<8x1xi32> to vector<8x256xi32>
    %310 = arith.cmpi eq, %44, %309 : vector<8x256xi32>
    %c0_70 = arith.constant 0 : index
    %c26 = arith.constant 26 : index
    %311 = vector.load %arg2[%c0_70, %c26] : memref<8x128xi32, #tpu.memory_space<vmem>>, vector<8x1xi32>
    %c0_i32_71 = arith.constant 0 : i32
    %312 = vector.shape_cast %311 : vector<8x1xi32> to vector<8x1xi32>
    %313 = vector.broadcast %312 : vector<8x1xi32> to vector<8x256xi32>
    %314 = vector.broadcast %c0_i32_71 : i32 to vector<8x256xi32>
    %315 = arith.select %310, %313, %314 : vector<8x256xi1>, vector<8x256xi32>
    %316 = arith.addi %306, %315 : vector<8x256xi32>
    %c216_i32 = arith.constant 216 : i32
    %317 = vector.broadcast %c216_i32 : i32 to vector<8x1xi32>
    %318 = arith.addi %45, %317 : vector<8x1xi32>
    %319 = vector.broadcast %318 : vector<8x1xi32> to vector<8x256xi32>
    %320 = arith.cmpi eq, %44, %319 : vector<8x256xi32>
    %c0_72 = arith.constant 0 : index
    %c27 = arith.constant 27 : index
    %321 = vector.load %arg2[%c0_72, %c27] : memref<8x128xi32, #tpu.memory_space<vmem>>, vector<8x1xi32>
    %c0_i32_73 = arith.constant 0 : i32
    %322 = vector.shape_cast %321 : vector<8x1xi32> to vector<8x1xi32>
    %323 = vector.broadcast %322 : vector<8x1xi32> to vector<8x256xi32>
    %324 = vector.broadcast %c0_i32_73 : i32 to vector<8x256xi32>
    %325 = arith.select %320, %323, %324 : vector<8x256xi1>, vector<8x256xi32>
    %326 = arith.addi %316, %325 : vector<8x256xi32>
    %c224_i32 = arith.constant 224 : i32
    %327 = vector.broadcast %c224_i32 : i32 to vector<8x1xi32>
    %328 = arith.addi %45, %327 : vector<8x1xi32>
    %329 = vector.broadcast %328 : vector<8x1xi32> to vector<8x256xi32>
    %330 = arith.cmpi eq, %44, %329 : vector<8x256xi32>
    %c0_74 = arith.constant 0 : index
    %c28 = arith.constant 28 : index
    %331 = vector.load %arg2[%c0_74, %c28] : memref<8x128xi32, #tpu.memory_space<vmem>>, vector<8x1xi32>
    %c0_i32_75 = arith.constant 0 : i32
    %332 = vector.shape_cast %331 : vector<8x1xi32> to vector<8x1xi32>
    %333 = vector.broadcast %332 : vector<8x1xi32> to vector<8x256xi32>
    %334 = vector.broadcast %c0_i32_75 : i32 to vector<8x256xi32>
    %335 = arith.select %330, %333, %334 : vector<8x256xi1>, vector<8x256xi32>
    %336 = arith.addi %326, %335 : vector<8x256xi32>
    %c232_i32 = arith.constant 232 : i32
    %337 = vector.broadcast %c232_i32 : i32 to vector<8x1xi32>
    %338 = arith.addi %45, %337 : vector<8x1xi32>
    %339 = vector.broadcast %338 : vector<8x1xi32> to vector<8x256xi32>
    %340 = arith.cmpi eq, %44, %339 : vector<8x256xi32>
    %c0_76 = arith.constant 0 : index
    %c29 = arith.constant 29 : index
    %341 = vector.load %arg2[%c0_76, %c29] : memref<8x128xi32, #tpu.memory_space<vmem>>, vector<8x1xi32>
    %c0_i32_77 = arith.constant 0 : i32
    %342 = vector.shape_cast %341 : vector<8x1xi32> to vector<8x1xi32>
    %343 = vector.broadcast %342 : vector<8x1xi32> to vector<8x256xi32>
    %344 = vector.broadcast %c0_i32_77 : i32 to vector<8x256xi32>
    %345 = arith.select %340, %343, %344 : vector<8x256xi1>, vector<8x256xi32>
    %346 = arith.addi %336, %345 : vector<8x256xi32>
    %c240_i32 = arith.constant 240 : i32
    %347 = vector.broadcast %c240_i32 : i32 to vector<8x1xi32>
    %348 = arith.addi %45, %347 : vector<8x1xi32>
    %349 = vector.broadcast %348 : vector<8x1xi32> to vector<8x256xi32>
    %350 = arith.cmpi eq, %44, %349 : vector<8x256xi32>
    %c0_78 = arith.constant 0 : index
    %c30 = arith.constant 30 : index
    %351 = vector.load %arg2[%c0_78, %c30] : memref<8x128xi32, #tpu.memory_space<vmem>>, vector<8x1xi32>
    %c0_i32_79 = arith.constant 0 : i32
    %352 = vector.shape_cast %351 : vector<8x1xi32> to vector<8x1xi32>
    %353 = vector.broadcast %352 : vector<8x1xi32> to vector<8x256xi32>
    %354 = vector.broadcast %c0_i32_79 : i32 to vector<8x256xi32>
    %355 = arith.select %350, %353, %354 : vector<8x256xi1>, vector<8x256xi32>
    %356 = arith.addi %346, %355 : vector<8x256xi32>
    %c248_i32 = arith.constant 248 : i32
    %357 = vector.broadcast %c248_i32 : i32 to vector<8x1xi32>
    %358 = arith.addi %45, %357 : vector<8x1xi32>
    %359 = vector.broadcast %358 : vector<8x1xi32> to vector<8x256xi32>
    %360 = arith.cmpi eq, %44, %359 : vector<8x256xi32>
    %c0_80 = arith.constant 0 : index
    %c31 = arith.constant 31 : index
    %361 = vector.load %arg2[%c0_80, %c31] : memref<8x128xi32, #tpu.memory_space<vmem>>, vector<8x1xi32>
    %c0_i32_81 = arith.constant 0 : i32
    %362 = vector.shape_cast %361 : vector<8x1xi32> to vector<8x1xi32>
    %363 = vector.broadcast %362 : vector<8x1xi32> to vector<8x256xi32>
    %364 = vector.broadcast %c0_i32_81 : i32 to vector<8x256xi32>
    %365 = arith.select %360, %363, %364 : vector<8x256xi1>, vector<8x256xi32>
    %366 = arith.addi %356, %365 : vector<8x256xi32>
    %c256_i32 = arith.constant 256 : i32
    %367 = vector.broadcast %c256_i32 : i32 to vector<8x1xi32>
    %368 = arith.addi %45, %367 : vector<8x1xi32>
    %369 = vector.broadcast %368 : vector<8x1xi32> to vector<8x256xi32>
    %370 = arith.cmpi eq, %44, %369 : vector<8x256xi32>
    %c0_82 = arith.constant 0 : index
    %c32 = arith.constant 32 : index
    %371 = vector.load %arg2[%c0_82, %c32] : memref<8x128xi32, #tpu.memory_space<vmem>>, vector<8x1xi32>
    %c0_i32_83 = arith.constant 0 : i32
    %372 = vector.shape_cast %371 : vector<8x1xi32> to vector<8x1xi32>
    %373 = vector.broadcast %372 : vector<8x1xi32> to vector<8x256xi32>
    %374 = vector.broadcast %c0_i32_83 : i32 to vector<8x256xi32>
    %375 = arith.select %370, %373, %374 : vector<8x256xi1>, vector<8x256xi32>
    %376 = arith.addi %366, %375 : vector<8x256xi32>
    %c264_i32 = arith.constant 264 : i32
    %377 = vector.broadcast %c264_i32 : i32 to vector<8x1xi32>
    %378 = arith.addi %45, %377 : vector<8x1xi32>
    %379 = vector.broadcast %378 : vector<8x1xi32> to vector<8x256xi32>
    %380 = arith.cmpi eq, %44, %379 : vector<8x256xi32>
    %c0_84 = arith.constant 0 : index
    %c33 = arith.constant 33 : index
    %381 = vector.load %arg2[%c0_84, %c33] : memref<8x128xi32, #tpu.memory_space<vmem>>, vector<8x1xi32>
    %c0_i32_85 = arith.constant 0 : i32
    %382 = vector.shape_cast %381 : vector<8x1xi32> to vector<8x1xi32>
    %383 = vector.broadcast %382 : vector<8x1xi32> to vector<8x256xi32>
    %384 = vector.broadcast %c0_i32_85 : i32 to vector<8x256xi32>
    %385 = arith.select %380, %383, %384 : vector<8x256xi1>, vector<8x256xi32>
    %386 = arith.addi %376, %385 : vector<8x256xi32>
    %c272_i32 = arith.constant 272 : i32
    %387 = vector.broadcast %c272_i32 : i32 to vector<8x1xi32>
    %388 = arith.addi %45, %387 : vector<8x1xi32>
    %389 = vector.broadcast %388 : vector<8x1xi32> to vector<8x256xi32>
    %390 = arith.cmpi eq, %44, %389 : vector<8x256xi32>
    %c0_86 = arith.constant 0 : index
    %c34 = arith.constant 34 : index
    %391 = vector.load %arg2[%c0_86, %c34] : memref<8x128xi32, #tpu.memory_space<vmem>>, vector<8x1xi32>
    %c0_i32_87 = arith.constant 0 : i32
    %392 = vector.shape_cast %391 : vector<8x1xi32> to vector<8x1xi32>
    %393 = vector.broadcast %392 : vector<8x1xi32> to vector<8x256xi32>
    %394 = vector.broadcast %c0_i32_87 : i32 to vector<8x256xi32>
    %395 = arith.select %390, %393, %394 : vector<8x256xi1>, vector<8x256xi32>
    %396 = arith.addi %386, %395 : vector<8x256xi32>
    %c280_i32 = arith.constant 280 : i32
    %397 = vector.broadcast %c280_i32 : i32 to vector<8x1xi32>
    %398 = arith.addi %45, %397 : vector<8x1xi32>
    %399 = vector.broadcast %398 : vector<8x1xi32> to vector<8x256xi32>
    %400 = arith.cmpi eq, %44, %399 : vector<8x256xi32>
    %c0_88 = arith.constant 0 : index
    %c35 = arith.constant 35 : index
    %401 = vector.load %arg2[%c0_88, %c35] : memref<8x128xi32, #tpu.memory_space<vmem>>, vector<8x1xi32>
    %c0_i32_89 = arith.constant 0 : i32
    %402 = vector.shape_cast %401 : vector<8x1xi32> to vector<8x1xi32>
    %403 = vector.broadcast %402 : vector<8x1xi32> to vector<8x256xi32>
    %404 = vector.broadcast %c0_i32_89 : i32 to vector<8x256xi32>
    %405 = arith.select %400, %403, %404 : vector<8x256xi1>, vector<8x256xi32>
    %406 = arith.addi %396, %405 : vector<8x256xi32>
    %c288_i32 = arith.constant 288 : i32
    %407 = vector.broadcast %c288_i32 : i32 to vector<8x1xi32>
    %408 = arith.addi %45, %407 : vector<8x1xi32>
    %409 = vector.broadcast %408 : vector<8x1xi32> to vector<8x256xi32>
    %410 = arith.cmpi eq, %44, %409 : vector<8x256xi32>
    %c0_90 = arith.constant 0 : index
    %c36 = arith.constant 36 : index
    %411 = vector.load %arg2[%c0_90, %c36] : memref<8x128xi32, #tpu.memory_space<vmem>>, vector<8x1xi32>
    %c0_i32_91 = arith.constant 0 : i32
    %412 = vector.shape_cast %411 : vector<8x1xi32> to vector<8x1xi32>
    %413 = vector.broadcast %412 : vector<8x1xi32> to vector<8x256xi32>
    %414 = vector.broadcast %c0_i32_91 : i32 to vector<8x256xi32>
    %415 = arith.select %410, %413, %414 : vector<8x256xi1>, vector<8x256xi32>
    %416 = arith.addi %406, %415 : vector<8x256xi32>
    %c296_i32 = arith.constant 296 : i32
    %417 = vector.broadcast %c296_i32 : i32 to vector<8x1xi32>
    %418 = arith.addi %45, %417 : vector<8x1xi32>
    %419 = vector.broadcast %418 : vector<8x1xi32> to vector<8x256xi32>
    %420 = arith.cmpi eq, %44, %419 : vector<8x256xi32>
    %c0_92 = arith.constant 0 : index
    %c37 = arith.constant 37 : index
    %421 = vector.load %arg2[%c0_92, %c37] : memref<8x128xi32, #tpu.memory_space<vmem>>, vector<8x1xi32>
    %c0_i32_93 = arith.constant 0 : i32
    %422 = vector.shape_cast %421 : vector<8x1xi32> to vector<8x1xi32>
    %423 = vector.broadcast %422 : vector<8x1xi32> to vector<8x256xi32>
    %424 = vector.broadcast %c0_i32_93 : i32 to vector<8x256xi32>
    %425 = arith.select %420, %423, %424 : vector<8x256xi1>, vector<8x256xi32>
    %426 = arith.addi %416, %425 : vector<8x256xi32>
    %c304_i32 = arith.constant 304 : i32
    %427 = vector.broadcast %c304_i32 : i32 to vector<8x1xi32>
    %428 = arith.addi %45, %427 : vector<8x1xi32>
    %429 = vector.broadcast %428 : vector<8x1xi32> to vector<8x256xi32>
    %430 = arith.cmpi eq, %44, %429 : vector<8x256xi32>
    %c0_94 = arith.constant 0 : index
    %c38 = arith.constant 38 : index
    %431 = vector.load %arg2[%c0_94, %c38] : memref<8x128xi32, #tpu.memory_space<vmem>>, vector<8x1xi32>
    %c0_i32_95 = arith.constant 0 : i32
    %432 = vector.shape_cast %431 : vector<8x1xi32> to vector<8x1xi32>
    %433 = vector.broadcast %432 : vector<8x1xi32> to vector<8x256xi32>
    %434 = vector.broadcast %c0_i32_95 : i32 to vector<8x256xi32>
    %435 = arith.select %430, %433, %434 : vector<8x256xi1>, vector<8x256xi32>
    %436 = arith.addi %426, %435 : vector<8x256xi32>
    %c312_i32 = arith.constant 312 : i32
    %437 = vector.broadcast %c312_i32 : i32 to vector<8x1xi32>
    %438 = arith.addi %45, %437 : vector<8x1xi32>
    %439 = vector.broadcast %438 : vector<8x1xi32> to vector<8x256xi32>
    %440 = arith.cmpi eq, %44, %439 : vector<8x256xi32>
    %c0_96 = arith.constant 0 : index
    %c39 = arith.constant 39 : index
    %441 = vector.load %arg2[%c0_96, %c39] : memref<8x128xi32, #tpu.memory_space<vmem>>, vector<8x1xi32>
    %c0_i32_97 = arith.constant 0 : i32
    %442 = vector.shape_cast %441 : vector<8x1xi32> to vector<8x1xi32>
    %443 = vector.broadcast %442 : vector<8x1xi32> to vector<8x256xi32>
    %444 = vector.broadcast %c0_i32_97 : i32 to vector<8x256xi32>
    %445 = arith.select %440, %443, %444 : vector<8x256xi1>, vector<8x256xi32>
    %446 = arith.addi %436, %445 : vector<8x256xi32>
    %cst = arith.constant dense<0> : vector<256xi32>
    %447 = vector.multi_reduction <add>, %446, %cst [0] : vector<8x256xi32> to vector<256xi32>
    %448 = vector.shape_cast %447 : vector<256xi32> to vector<1x256xi32>
    %c1_i32 = arith.constant 1 : i32
    %449 = vector.broadcast %c1_i32 : i32 to vector<1x256xi32>
    %450 = arith.subi %448, %449 : vector<1x256xi32>
    %c0_98 = arith.constant 0 : index
    %c0_99 = arith.constant 0 : index
    %451 = vector.load %arg3[%c0_98, %c0_99] : memref<1x256xi32, #tpu.memory_space<vmem>>, vector<1x256xi32>
    tpu.vector_store %arg3[%c0_98, %c0_99], %450 {strides = array<i32>} : memref<1x256xi32, #tpu.memory_space<vmem>>, vector<1x256xi32>,
    return
  }
  func.func @transform_0(%arg0: i32) -> (i32, i32) {
    %c0_i32 = arith.constant 0 : i32
    %c0_i32_0 = arith.constant 0 : i32
    return %c0_i32, %arg0 : i32, i32
  }
  func.func @transform_1(%arg0: i32) -> (i32, i32) {
    %c0_i32 = arith.constant 0 : i32
    %c0_i32_0 = arith.constant 0 : i32
    %c0_i32_1 = arith.constant 0 : i32
    return %c0_i32, %c0_i32_0 : i32, i32
  }
  func.func @transform_2(%arg0: i32) -> (i32, i32) {
    %c0_i32 = arith.constant 0 : i32
    %c0_i32_0 = arith.constant 0 : i32
    return %c0_i32, %arg0 : i32, i32
  }
}

</mosaic_0001>

<bundles_post_ra>
// kernel: tpu_custom_call.1
= control target key start
LH: loop header
LB: loop body
LE: loop exit
PB: predicated region body
PF: predicated region fallthrough
CT: control target
= control target key end

     0   :  { %7 = vsyncpa [#allocation3], 0  ;;  %s954_s0 = inlined_call_operand.hbm [shape: s32[3,256], index: 0, kind: input, shape index: {}]   ;;  %s955_s1 = inlined_call_operand.hbm [shape: s32[8,128], index: 1, kind: input, shape index: {}]   ;;  %s956_s2 = inlined_call_operand.hbm [shape: s32[1,256], index: 2, kind: output, shape index: {}]  }
   0x1   :  { %8 = vsyncpa [#allocation6], 0 }
   0x2   :  { %9 = vsyncpa [#allocation4], 0  ;;  %s683_s9 = smov [#allocation2]   ;;  %s684_s11 = smov [#allocation5]  }
   0x3   :  { %s16_s10 = sshll.u32 %s683_s9, 4  ;;  %s26_s12 = sshll.u32 %s684_s11, 4  ;;  %s17_s10 = int_to_ptr.vmem [resolvable:$true] %s16_s10  ;;  %s27_s12 = int_to_ptr.vmem [resolvable:$true] %s26_s12 }
   0x4   :  { %s611_s15 = scalar_lea.hbm %s954_s0, 128 }
   0x5   :  { %p612_p0 = scmp.ne.s32.totalorder %s954_s0, %s611_s15  ;;  %p615_p1 = scmp.lt.u32.totalorder %s611_s15, %s954_s0 }
   0x7   :  { %p617_p2 = pnand %p615_p1, %p612_p0 }
   0x9   :  { %620 = shalt.err (!%p617_p2)
}
   0xa   :  { %s621_s20 = scalar_lea.vmem %s17_s10, 128  ;;  %p626_p4 = scmp.lt.s32.totalorder %s17_s10, %s17_s10 }
   0xb   :  { %p622_p3 = scmp.ne.s32.totalorder %s17_s10, %s621_s20  ;;  %p627_p5 = scmp.lt.s32.totalorder %s621_s20, %s621_s20 }
   0xd   :  { %p628_p6 = por %p627_p5, %p626_p4 }
   0xf   :  { %p629_p7 = pnand %p628_p6, %p622_p3 }
  0x11   :  { %632 = shalt.err (!%p629_p7)
}
  0x12   :  { %19 = dma.hbm_to_vmem [thread:$0]  %s954_s0, 128, %s17_s10, [#allocation3]  }
  0x13   :  { %s633_s25 = scalar_lea.hbm %s955_s1, 128 }
  0x14   :  { %p634_p8 = scmp.ne.s32.totalorder %s955_s1, %s633_s25  ;;  %p637_p9 = scmp.lt.u32.totalorder %s633_s25, %s955_s1 }
  0x16   :  { %p639_p10 = pnand %p637_p9, %p634_p8 }
  0x18   :  { %642 = shalt.err (!%p639_p10)
}
  0x19   :  { %s643_s30 = scalar_lea.vmem %s27_s12, 128  ;;  %p648_p12 = scmp.lt.s32.totalorder %s27_s12, %s27_s12 }
  0x1a   :  { %p644_p11 = scmp.ne.s32.totalorder %s27_s12, %s643_s30  ;;  %p649_p13 = scmp.lt.s32.totalorder %s643_s30, %s643_s30 }
  0x1c   :  { %p650_p0 = por %p649_p13, %p648_p12 }
  0x1e   :  { %p651_p1 = pnand %p650_p0, %p644_p11 }
  0x20   :  { %654 = shalt.err (!%p651_p1)
}
  0x21   :  { %29 = dma.hbm_to_vmem [thread:$0]  %s955_s1, 128, %s27_s12, [#allocation6]  }
  0x22   :  { %677 = dma.done.wait [#allocation3], 128  }
  0x23   :  { %678 = vsyncadd [#allocation3], 4294967168 }
  0x24   :  { %679 = dma.done.wait [#allocation6], 128  }
  0x25   :  { %680 = vsyncadd [#allocation6], 4294967168  ;;  %v685_v0 = vmov 2   ;;  %v686_v1 = vmov 0   ;;  %v766_v2 = vld [vmem:[#allocation5] sm:$0xff]  ;;  %v687_v3 = vmov 3   ;;  %v66_v50 = vlaneseq }
  0x26   :  { %572 = vset.pattern.permute.xlu1 %v685_v0  ;;  %570 = vset.pattern.permute.xlu0 %v686_v1  ;;  %v688_v4 = vmov 1   ;;  %v689_v5 = vmov 4   ;;  %v690_v6 = vmov 5   ;;  %v691_v7 = vmov 6   ;;  %s726_s1 = smov [#allocation7]  }
  0x27   :  { %98 = vperm.xlu1 %572, %v766_v2   ;;  %80 = vperm.xlu0 %570, %v766_v2   ;;  %v692_v8 = vmov 8   ;;  %v693_v9 = vmov 7   ;;  %v694_v10 = vmov 11   ;;  %v695_v11 = vmov 9   ;;  %s514_s4 = sshll.u32 %s726_s1, 4  ;;  %s515_s4 = int_to_ptr.vmem [resolvable:$true] %s514_s4 }
  0x28   :  { %v696_v12 = vmov 14   ;;  %v697_v13 = vmov 10   ;;  %v698_v14 = vmov 17   ;;  %v699_v15 = vmov 12   ;;  %s655_s5 = scalar_lea.vmem %s515_s4, 32  ;;  %p660_p3 = scmp.lt.s32.totalorder %s515_s4, %s515_s4 }
  0x29   :  { %v700_v16 = vmov 20   ;;  %v701_v17 = vmov 13   ;;  %v702_v18 = vmov 23   ;;  %v703_v19 = vmov 15   ;;  %p656_p2 = scmp.ne.s32.totalorder %s515_s4, %s655_s5  ;;  %p661_p4 = scmp.lt.s32.totalorder %s655_s5, %s655_s5 }
  0x2a   :  { %v704_v20 = vmov 26   ;;  %v705_v21 = vmov 16   ;;  %v706_v22 = vmov 29   ;;  %v707_v23 = vmov 18  }
  0x2b   :  { %573 = vset.pattern.permute.xlu1 %v687_v3  ;;  %571 = vset.pattern.permute.xlu0 %v688_v4  ;;  %v708_v24 = vmov 32   ;;  %v709_v25 = vmov 19   ;;  %v710_v26 = vmov 35   ;;  %v711_v27 = vmov 21   ;;  %p662_p5 = por %p661_p4, %p660_p3 }
  0x2c   :  { %108 = vperm.xlu1 %573, %v766_v2   ;;  %88 = vperm.xlu0 %571, %v766_v2   ;;  %v712_v28 = vmov 38   ;;  %v713_v29 = vmov 22   ;;  %v714_v30 = vmov 39   ;;  %v715_v31 = vmov 24  }
  0x2d   :  { %v716_v32 = vmov 25   ;;  %v717_v33 = vmov 27   ;;  %v718_v34 = vmov 28   ;;  %v719_v35 = vmov 30   ;;  %p663_p6 = pnand %p662_p5, %p656_p2 }
  0x2e   :  { %v36_v36 = vld [vmem:[#allocation2] ss:$4 sm:$0x3]  ;;  %v38_v37 = vld [vmem:[#allocation2 + $0x1] ss:$4 sm:$0x3] }
  0x2f   :  { %v720_v38 = vmov 31   ;;  %v42_v39 = vadd.s32 9, %v36_v36  ;;  %vm41_vm0 = vcmp.lt.s32.totalorder %v36_v36, 0  ;;  %v45_v40 = vadd.s32 7, %v38_v37 }
  0x30   :  { %574 = vset.pattern.permute.xlu1 %v689_v5  ;;  %575 = vset.pattern.permute.xlu0 %v690_v6  ;;  %vm44_vm1 = vcmp.lt.s32.totalorder %v38_v37, 0  ;;  %v40_v41 = vld [vmem:[#allocation2 + $0x2] ss:$4 sm:$0x3]  ;;  %v721_v43 = vmov 33   ;;  %v722_v47 = vmov 34  }
  0x31   :  { %118 = vperm.xlu1 %574, %v766_v2   ;;  %128 = vperm.xlu0 %575, %v766_v2   ;;  %v43_v42 = vsel %vm41_vm0, %v42_v39, %v36_v36  ;;  %v46_v44 = vsel %vm44_vm1, %v45_v40, %v38_v37  ;;  %v48_v45 = vadd.s32 5, %v40_v41  ;;  %vm47_vm4 = vcmp.lt.s32.totalorder %v40_v41, 0 }
  0x32   :  { %vm50_vm2 = vcmp.ge.s32.totalorder %v43_v42, 0  ;;  %vm51_vm3 = vcmp.lt.s32.totalorder %v43_v42, 9  ;;  %v61_v46 = vmul.u32 7, %v43_v42  ;;  %vm53_vm6 = vcmp.ge.s32.totalorder %v46_v44, 0 }
  0x33   :  { %vm52_vm5 = vmand %vm50_vm2, %vm51_vm3  ;;  %v49_v48 = vsel %vm47_vm4, %v48_v45, %v40_v41  ;;  %vm55_vm8 = vcmp.lt.s32.totalorder %v46_v44, 7  ;;  %v723_v51 = vmov 36   ;;  %v808_v53 = vshrl.u32 %v66_v50, 7 }
  0x34   :  { %vm54_vm7 = vmand %vm52_vm5, %vm53_vm6  ;;  %v62_v49 = vadd.s32 %v61_v46, %v46_v44  ;;  %vm57_vm10 = vcmp.ge.s32.totalorder %v49_v48, 0  ;;  %vm59_vm12 = vcmp.lt.s32.totalorder %v49_v48, 5  ;;  %v724_v55 = vmov 37  }
  0x35   :  { %576 = vset.pattern.permute.xlu1 %v691_v7  ;;  %578 = vset.pattern.permute.xlu0 %v692_v8  ;;  %vm56_vm9 = vmand %vm54_vm7, %vm55_vm8  ;;  %v68_v56 = vsub.s32 0, %v808_v53  ;;  %v72_v57 = vsub.s32 1, %v808_v53  ;;  %v84_v61 = vadd.s32 8, %v808_v53  ;;  %v94_v0 = vadd.s32 16, %v808_v53 }
  0x36   :  { %138 = vperm.xlu1 %576, %v766_v2   ;;  %158 = vperm.xlu0 %578, %v766_v2   ;;  %v63_v52 = vmul.u32 5, %v62_v49  ;;  %vm58_vm11 = vmand %vm56_vm9, %vm57_vm10  ;;  %v104_v1 = vadd.s32 24, %v808_v53  ;;  %v114_v4 = vadd.s32 32, %v808_v53  ;;  %v164_v40 = vadd.s32 72, %v808_v53 }
  0x37   :  { %vm60_vm13 = vmand %vm58_vm11, %vm59_vm12  ;;  %v184_v49 = vadd.s32 88, %v808_v53 }
  0x38   :  { %v64_v54 = vadd.s32 %v63_v52, %v49_v48 }
  0x3a   :  { %577 = vset.pattern.permute.xlu1 %v693_v9  ;;  %581 = vset.pattern.permute.xlu0 %v694_v10  ;;  %v65_v58 = vsel %vm60_vm13, %v64_v54, 4294967295  ;;  %v124_v9 = vadd.s32 40, %v808_v53 }
  0x3b   :  { %148 = vperm.xlu1 %577, %v766_v2   ;;  %188 = vperm.xlu0 %581, %v766_v2   ;;  %v815_v59 = vrot.slane %v65_v58, %v68_v56  ;;  %v817_v60 = vrot.slane %v65_v58, %v72_v57 }
  0x3d   :  { %vm76_vm14 = vcmp.eq.s32.totalorder %v815_v59, %v808_v53  ;;  %vm77_vm15 = vcmp.eq.s32.totalorder %v817_v60, %v808_v53  ;;  %vm85_vm0 = vcmp.eq.s32.totalorder %v815_v59, %v84_v61  ;;  %vm86_vm1 = vcmp.eq.s32.totalorder %v817_v60, %v84_v61 }
  0x3e   :  { %vm95_vm2 = vcmp.eq.s32.totalorder %v815_v59, %v94_v0  ;;  %vm96_vm3 = vcmp.eq.s32.totalorder %v817_v60, %v94_v0  ;;  %vm105_vm4 = vcmp.eq.s32.totalorder %v815_v59, %v104_v1  ;;  %vm106_vm5 = vcmp.eq.s32.totalorder %v817_v60, %v104_v1 }
  0x3f   :  { %579 = vset.pattern.permute.xlu1 %v695_v11  ;;  %584 = vset.pattern.permute.xlu0 %v696_v12  ;;  %vm115_vm6 = vcmp.eq.s32.totalorder %v815_v59, %v114_v4  ;;  %vm116_vm7 = vcmp.eq.s32.totalorder %v817_v60, %v114_v4  ;;  %vm125_vm8 = vcmp.eq.s32.totalorder %v815_v59, %v124_v9 }
  0x40   :  { %168 = vperm.xlu1 %579, %v766_v2   ;;  %218 = vperm.xlu0 %584, %v766_v2   ;;  %vm126_vm9 = vcmp.eq.s32.totalorder %v817_v60, %v124_v9 }
  0x44   :  { %580 = vset.pattern.permute.xlu1 %v697_v13  ;;  %587 = vset.pattern.permute.xlu0 %v698_v14 }
  0x45   :  { %178 = vperm.xlu1 %580, %v766_v2   ;;  %248 = vperm.xlu0 %587, %v766_v2  }
  0x49   :  { %582 = vset.pattern.permute.xlu1 %v699_v15  ;;  %590 = vset.pattern.permute.xlu0 %v700_v16  ;;  %v134_v16 = vadd.s32 48, %v808_v53 }
  0x4a   :  { %198 = vperm.xlu1 %582, %v766_v2   ;;  %278 = vperm.xlu0 %590, %v766_v2  }
  0x4b   :  { %vm135_vm10 = vcmp.eq.s32.totalorder %v815_v59, %v134_v16  ;;  %vm136_vm11 = vcmp.eq.s32.totalorder %v817_v60, %v134_v16  ;;  %v224_v16 = vadd.s32 120, %v808_v53 }
  0x4e   :  { %583 = vset.pattern.permute.xlu1 %v701_v17  ;;  %593 = vset.pattern.permute.xlu0 %v702_v18 }
  0x4f   :  { %208 = vperm.xlu1 %583, %v766_v2   ;;  %308 = vperm.xlu0 %593, %v766_v2  }
  0x53   :  { %585 = vset.pattern.permute.xlu1 %v703_v19  ;;  %596 = vset.pattern.permute.xlu0 %v704_v20 }
  0x54   :  { %228 = vperm.xlu1 %585, %v766_v2   ;;  %338 = vperm.xlu0 %596, %v766_v2  }
  0x58   :  { %586 = vset.pattern.permute.xlu1 %v705_v21  ;;  %599 = vset.pattern.permute.xlu0 %v706_v22 }
  0x59   :  { %238 = vperm.xlu1 %586, %v766_v2   ;;  %368 = vperm.xlu0 %599, %v766_v2  }
  0x5d   :  { %588 = vset.pattern.permute.xlu1 %v707_v23  ;;  %602 = vset.pattern.permute.xlu0 %v708_v24 }
  0x5e   :  { %258 = vperm.xlu1 %588, %v766_v2   ;;  %398 = vperm.xlu0 %602, %v766_v2  }
  0x62   :  { %589 = vset.pattern.permute.xlu1 %v709_v25  ;;  %605 = vset.pattern.permute.xlu0 %v710_v26 }
  0x63   :  { %268 = vperm.xlu1 %589, %v766_v2   ;;  %428 = vperm.xlu0 %605, %v766_v2  }
  0x67   :  { %591 = vset.pattern.permute.xlu1 %v711_v27  ;;  %608 = vset.pattern.permute.xlu0 %v712_v28 }
  0x68   :  { %288 = vperm.xlu1 %591, %v766_v2   ;;  %458 = vperm.xlu0 %608, %v766_v2  }
  0x6c   :  { %592 = vset.pattern.permute.xlu1 %v713_v29  ;;  %610 = vset.pattern.permute.xlu0 %v714_v30  ;;  %v144_v29 = vadd.s32 56, %v808_v53 }
  0x6d   :  { %298 = vperm.xlu1 %592, %v766_v2  }
  0x6e   :  { %vm145_vm12 = vcmp.eq.s32.totalorder %v815_v59, %v144_v29  ;;  %vm146_vm13 = vcmp.eq.s32.totalorder %v817_v60, %v144_v29 }
  0x71   :  { %594 = vset.pattern.permute.xlu1 %v715_v31  ;;  %v154_v31 = vadd.s32 64, %v808_v53 }
  0x72   :  { %318 = vperm.xlu1 %594, %v766_v2  }
  0x76   :  { %595 = vset.pattern.permute.xlu1 %v716_v32 }
  0x77   :  { %328 = vperm.xlu1 %595, %v766_v2  }
  0x7b   :  { %597 = vset.pattern.permute.xlu1 %v717_v33 }
  0x7c   :  { %348 = vperm.xlu1 %597, %v766_v2  }
  0x80   :  { %598 = vset.pattern.permute.xlu1 %v718_v34 }
  0x81   :  { %358 = vperm.xlu1 %598, %v766_v2  }
  0x85   :  { %600 = vset.pattern.permute.xlu1 %v719_v35 }
  0x86   :  { %378 = vperm.xlu1 %600, %v766_v2  }
  0x8a   :  { %601 = vset.pattern.permute.xlu1 %v720_v38 }
  0x8b   :  { %388 = vperm.xlu1 %601, %v766_v2  }
  0x8f   :  { %603 = vset.pattern.permute.xlu1 %v721_v43 }
  0x90   :  { %408 = vperm.xlu1 %603, %v766_v2  }
  0x94   :  { %604 = vset.pattern.permute.xlu1 %v722_v47  ;;  %v174_v47 = vadd.s32 80, %v808_v53 }
  0x95   :  { %418 = vperm.xlu1 %604, %v766_v2  }
  0x99   :  { %606 = vset.pattern.permute.xlu1 %v723_v51 }
  0x9a   :  { %438 = vperm.xlu1 %606, %v766_v2  }
  0x9e   :  { %607 = vset.pattern.permute.xlu1 %v724_v55 }
  0x9f   :  { %448 = vperm.xlu1 %607, %v766_v2  }
  0xa3   :  { %609 = vset.pattern.permute.xlu1 %v714_v30 }
  0xa4   :  { %468 = vperm.xlu1 %609, %v766_v2  }
  0xa6   :  { %v99_v62 = vpop.permute.xlu1 %98  ;;  %v81_v63 = vpop.permute.xlu0 %80 }
  0xa7   :  { %v82_v2 = vsel %vm76_vm14, %v81_v63, 0  ;;  %v83_v3 = vsel %vm77_vm15, %v81_v63, 0  ;;  %v100_v12 = vsel %vm95_vm2, %v99_v62, 0  ;;  %v101_v13 = vsel %vm96_vm3, %v99_v62, 0 }
  0xa8   :  { %vm155_vm14 = vcmp.eq.s32.totalorder %v815_v59, %v154_v31  ;;  %vm156_vm15 = vcmp.eq.s32.totalorder %v817_v60, %v154_v31  ;;  %vm175_vm2 = vcmp.eq.s32.totalorder %v815_v59, %v174_v47  ;;  %vm176_vm3 = vcmp.eq.s32.totalorder %v817_v60, %v174_v47 }
  0xa9   :  { %v194_v62 = vadd.s32 96, %v808_v53 }
  0xab   :  { %v109_v5 = vpop.permute.xlu1 %108  ;;  %v89_v6 = vpop.permute.xlu0 %88 }
  0xac   :  { %v90_v7 = vsel %vm85_vm0, %v89_v6, 0  ;;  %v91_v8 = vsel %vm86_vm1, %v89_v6, 0  ;;  %v110_v17 = vsel %vm105_vm4, %v109_v5, 0  ;;  %v111_v18 = vsel %vm106_vm5, %v109_v5, 0 }
  0xad   :  { %v92_v10 = vadd.s32 %v90_v7, %v82_v2  ;;  %v93_v11 = vadd.s32 %v91_v8, %v83_v3  ;;  %vm165_vm0 = vcmp.eq.s32.totalorder %v815_v59, %v164_v40  ;;  %vm166_vm1 = vcmp.eq.s32.totalorder %v817_v60, %v164_v40 }
  0xae   :  { %vm185_vm4 = vcmp.eq.s32.totalorder %v815_v59, %v184_v49  ;;  %vm186_vm5 = vcmp.eq.s32.totalorder %v817_v60, %v184_v49  ;;  %v204_v5 = vadd.s32 104, %v808_v53  ;;  %v214_v7 = vadd.s32 112, %v808_v53 }
  0xaf   :  { %v102_v14 = vadd.s32 %v100_v12, %v92_v10  ;;  %v103_v15 = vadd.s32 %v101_v13, %v93_v11 }
  0xb0   :  { %v119_v19 = vpop.permute.xlu1 %118  ;;  %v129_v20 = vpop.permute.xlu0 %128 }
  0xb1   :  { %v112_v21 = vadd.s32 %v110_v17, %v102_v14  ;;  %v113_v22 = vadd.s32 %v111_v18, %v103_v15  ;;  %v120_v23 = vsel %vm115_vm6, %v119_v19, 0  ;;  %v121_v24 = vsel %vm116_vm7, %v119_v19, 0 }
  0xb2   :  { %v130_v27 = vsel %vm125_vm8, %v129_v20, 0  ;;  %v131_v28 = vsel %vm126_vm9, %v129_v20, 0  ;;  %vm195_vm6 = vcmp.eq.s32.totalorder %v815_v59, %v194_v62  ;;  %vm196_vm7 = vcmp.eq.s32.totalorder %v817_v60, %v194_v62 }
  0xb3   :  { %v122_v25 = vadd.s32 %v120_v23, %v112_v21  ;;  %v123_v26 = vadd.s32 %v121_v24, %v113_v22  ;;  %vm205_vm8 = vcmp.eq.s32.totalorder %v815_v59, %v204_v5  ;;  %vm206_vm9 = vcmp.eq.s32.totalorder %v817_v60, %v204_v5 }
  0xb4   :  { %v234_v23 = vadd.s32 128, %v808_v53 }
  0xb5   :  { %v139_v30 = vpop.permute.xlu1 %138  ;;  %v132_v32 = vadd.s32 %v130_v27, %v122_v25  ;;  %v133_v33 = vadd.s32 %v131_v28, %v123_v26  ;;  %v159_v39 = vpop.permute.xlu0 %158  ;;  %v244_v25 = vadd.s32 136, %v808_v53 }
  0xb6   :  { %v140_v34 = vsel %vm135_vm10, %v139_v30, 0  ;;  %v141_v35 = vsel %vm136_vm11, %v139_v30, 0  ;;  %v160_v45 = vsel %vm155_vm14, %v159_v39, 0  ;;  %v161_v46 = vsel %vm156_vm15, %v159_v39, 0 }
  0xb7   :  { %v142_v36 = vadd.s32 %v140_v34, %v132_v32  ;;  %v143_v37 = vadd.s32 %v141_v35, %v133_v33  ;;  %vm215_vm10 = vcmp.eq.s32.totalorder %v815_v59, %v214_v7  ;;  %vm216_vm11 = vcmp.eq.s32.totalorder %v817_v60, %v214_v7 }
  0xb8   :  { %vm235_vm14 = vcmp.eq.s32.totalorder %v815_v59, %v234_v23  ;;  %vm236_vm15 = vcmp.eq.s32.totalorder %v817_v60, %v234_v23  ;;  %v254_v34 = vadd.s32 144, %v808_v53 }
  0xba   :  { %v149_v38 = vpop.permute.xlu1 %148  ;;  %v189_v61 = vpop.permute.xlu0 %188 }
  0xbb   :  { %v150_v41 = vsel %vm145_vm12, %v149_v38, 0  ;;  %v151_v42 = vsel %vm146_vm13, %v149_v38, 0  ;;  %v190_v3 = vsel %vm185_vm4, %v189_v61, 0  ;;  %v191_v4 = vsel %vm186_vm5, %v189_v61, 0 }
  0xbc   :  { %v152_v43 = vadd.s32 %v150_v41, %v142_v36  ;;  %v153_v44 = vadd.s32 %v151_v42, %v143_v37  ;;  %vm225_vm12 = vcmp.eq.s32.totalorder %v815_v59, %v224_v16  ;;  %vm226_vm13 = vcmp.eq.s32.totalorder %v817_v60, %v224_v16 }
  0xbd   :  { %v264_v41 = vadd.s32 152, %v808_v53 }
  0xbe   :  { %v162_v51 = vadd.s32 %v160_v45, %v152_v43  ;;  %v163_v52 = vadd.s32 %v161_v46, %v153_v44  ;;  %v274_v43 = vadd.s32 160, %v808_v53 }
  0xbf   :  { %v169_v48 = vpop.permute.xlu1 %168  ;;  %v219_v15 = vpop.permute.xlu0 %218  ;;  %vm265_vm4 = vcmp.eq.s32.totalorder %v815_v59, %v264_v41  ;;  %vm266_vm5 = vcmp.eq.s32.totalorder %v817_v60, %v264_v41 }
  0xc0   :  { %v170_v54 = vsel %vm165_vm0, %v169_v48, 0  ;;  %v171_v55 = vsel %vm166_vm1, %v169_v48, 0  ;;  %v220_v21 = vsel %vm215_vm10, %v219_v15, 0  ;;  %v221_v22 = vsel %vm216_vm11, %v219_v15, 0 }
  0xc1   :  { %v172_v56 = vadd.s32 %v170_v54, %v162_v51  ;;  %v173_v57 = vadd.s32 %v171_v55, %v163_v52  ;;  %vm245_vm0 = vcmp.eq.s32.totalorder %v815_v59, %v244_v25  ;;  %vm246_vm1 = vcmp.eq.s32.totalorder %v817_v60, %v244_v25 }
  0xc2   :  { %v284_v54 = vadd.s32 168, %v808_v53 }
  0xc4   :  { %v179_v58 = vpop.permute.xlu1 %178  ;;  %v249_v33 = vpop.permute.xlu0 %248 }
  0xc5   :  { %v180_v63 = vsel %vm175_vm2, %v179_v58, 0  ;;  %v181_v0 = vsel %vm176_vm3, %v179_v58, 0  ;;  %v250_v39 = vsel %vm245_vm0, %v249_v33, 0  ;;  %v251_v40 = vsel %vm246_vm1, %v249_v33, 0 }
  0xc6   :  { %v182_v1 = vadd.s32 %v180_v63, %v172_v56  ;;  %v183_v2 = vadd.s32 %v181_v0, %v173_v57  ;;  %vm255_vm2 = vcmp.eq.s32.totalorder %v815_v59, %v254_v34  ;;  %vm256_vm3 = vcmp.eq.s32.totalorder %v817_v60, %v254_v34 }
  0xc7   :  { %v294_v63 = vadd.s32 176, %v808_v53 }
  0xc8   :  { %v192_v8 = vadd.s32 %v190_v3, %v182_v1  ;;  %v193_v9 = vadd.s32 %v191_v4, %v183_v2  ;;  %v304_v1 = vadd.s32 184, %v808_v53 }
  0xc9   :  { %v199_v6 = vpop.permute.xlu1 %198  ;;  %v279_v52 = vpop.permute.xlu0 %278  ;;  %vm295_vm10 = vcmp.eq.s32.totalorder %v815_v59, %v294_v63  ;;  %vm296_vm11 = vcmp.eq.s32.totalorder %v817_v60, %v294_v63 }
  0xca   :  { %v200_v10 = vsel %vm195_vm6, %v199_v6, 0  ;;  %v201_v11 = vsel %vm196_vm7, %v199_v6, 0  ;;  %vm275_vm6 = vcmp.eq.s32.totalorder %v815_v59, %v274_v43  ;;  %vm276_vm7 = vcmp.eq.s32.totalorder %v817_v60, %v274_v43 }
  0xcb   :  { %v202_v12 = vadd.s32 %v200_v10, %v192_v8  ;;  %v203_v13 = vadd.s32 %v201_v11, %v193_v9  ;;  %v280_v61 = vsel %vm275_vm6, %v279_v52, 0  ;;  %v281_v62 = vsel %vm276_vm7, %v279_v52, 0 }
  0xcc   :  { %v314_v10 = vadd.s32 192, %v808_v53 }
  0xce   :  { %v209_v14 = vpop.permute.xlu1 %208  ;;  %v309_v9 = vpop.permute.xlu0 %308 }
  0xcf   :  { %v210_v17 = vsel %vm205_vm8, %v209_v14, 0  ;;  %v211_v18 = vsel %vm206_vm9, %v209_v14, 0  ;;  %vm285_vm8 = vcmp.eq.s32.totalorder %v815_v59, %v284_v54  ;;  %vm286_vm9 = vcmp.eq.s32.totalorder %v817_v60, %v284_v54 }
  0xd0   :  { %v212_v19 = vadd.s32 %v210_v17, %v202_v12  ;;  %v213_v20 = vadd.s32 %v211_v18, %v203_v13  ;;  %v324_v17 = vadd.s32 200, %v808_v53 }
  0xd2   :  { %v222_v26 = vadd.s32 %v220_v21, %v212_v19  ;;  %v223_v27 = vadd.s32 %v221_v22, %v213_v20  ;;  %v334_v19 = vadd.s32 208, %v808_v53  ;;  %vm325_vm0 = vcmp.eq.s32.totalorder %v815_v59, %v324_v17 }
  0xd3   :  { %v229_v24 = vpop.permute.xlu1 %228  ;;  %vm326_vm1 = vcmp.eq.s32.totalorder %v817_v60, %v324_v17 }
  0xd4   :  { %v230_v28 = vsel %vm225_vm12, %v229_v24, 0  ;;  %v231_v29 = vsel %vm226_vm13, %v229_v24, 0  ;;  %vm305_vm12 = vcmp.eq.s32.totalorder %v815_v59, %v304_v1  ;;  %vm306_vm13 = vcmp.eq.s32.totalorder %v817_v60, %v304_v1 }
  0xd5   :  { %v232_v30 = vadd.s32 %v230_v28, %v222_v26  ;;  %v233_v31 = vadd.s32 %v231_v29, %v223_v27  ;;  %v310_v15 = vsel %vm305_vm12, %v309_v9, 0  ;;  %v311_v16 = vsel %vm306_vm13, %v309_v9, 0  ;;  %v339_v27 = vpop.permute.xlu0 %338 }
  0xd6   :  { %v344_v28 = vadd.s32 216, %v808_v53 }
  0xd8   :  { %v239_v32 = vpop.permute.xlu1 %238 }
  0xd9   :  { %v240_v35 = vsel %vm235_vm14, %v239_v32, 0  ;;  %v241_v36 = vsel %vm236_vm15, %v239_v32, 0  ;;  %vm315_vm14 = vcmp.eq.s32.totalorder %v815_v59, %v314_v10  ;;  %vm316_vm15 = vcmp.eq.s32.totalorder %v817_v60, %v314_v10 }
  0xda   :  { %v242_v37 = vadd.s32 %v240_v35, %v232_v30  ;;  %v243_v38 = vadd.s32 %v241_v36, %v233_v31  ;;  %v354_v35 = vadd.s32 224, %v808_v53 }
  0xdc   :  { %v252_v44 = vadd.s32 %v250_v39, %v242_v37  ;;  %v253_v45 = vadd.s32 %v251_v40, %v243_v38  ;;  %v364_v37 = vadd.s32 232, %v808_v53  ;;  %vm355_vm6 = vcmp.eq.s32.totalorder %v815_v59, %v354_v35 }
  0xdd   :  { %v259_v42 = vpop.permute.xlu1 %258  ;;  %vm356_vm7 = vcmp.eq.s32.totalorder %v817_v60, %v354_v35 }
  0xde   :  { %v260_v46 = vsel %vm255_vm2, %v259_v42, 0  ;;  %v261_v47 = vsel %vm256_vm3, %v259_v42, 0  ;;  %vm335_vm2 = vcmp.eq.s32.totalorder %v815_v59, %v334_v19  ;;  %vm336_vm3 = vcmp.eq.s32.totalorder %v817_v60, %v334_v19 }
  0xdf   :  { %v262_v48 = vadd.s32 %v260_v46, %v252_v44  ;;  %v263_v49 = vadd.s32 %v261_v47, %v253_v45  ;;  %v340_v33 = vsel %vm335_vm2, %v339_v27, 0  ;;  %v341_v34 = vsel %vm336_vm3, %v339_v27, 0  ;;  %v369_v45 = vpop.permute.xlu0 %368 }
  0xe0   :  { %v374_v46 = vadd.s32 240, %v808_v53 }
  0xe2   :  { %v269_v51 = vpop.permute.xlu1 %268 }
  0xe3   :  { %v270_v55 = vsel %vm265_vm4, %v269_v51, 0  ;;  %v271_v56 = vsel %vm266_vm5, %v269_v51, 0  ;;  %vm345_vm4 = vcmp.eq.s32.totalorder %v815_v59, %v344_v28  ;;  %vm346_vm5 = vcmp.eq.s32.totalorder %v817_v60, %v344_v28 }
  0xe4   :  { %v272_v57 = vadd.s32 %v270_v55, %v262_v48  ;;  %v273_v58 = vadd.s32 %v271_v56, %v263_v49  ;;  %v384_v55 = vadd.s32 248, %v808_v53 }
  0xe6   :  { %v282_v2 = vadd.s32 %v280_v61, %v272_v57  ;;  %v283_v3 = vadd.s32 %v281_v62, %v273_v58  ;;  %v394_v57 = vadd.s32 256, %v808_v53  ;;  %vm385_vm12 = vcmp.eq.s32.totalorder %v815_v59, %v384_v55 }
  0xe7   :  { %v289_v0 = vpop.permute.xlu1 %288  ;;  %vm386_vm13 = vcmp.eq.s32.totalorder %v817_v60, %v384_v55 }
  0xe8   :  { %v290_v4 = vsel %vm285_vm8, %v289_v0, 0  ;;  %v291_v5 = vsel %vm286_vm9, %v289_v0, 0  ;;  %vm365_vm8 = vcmp.eq.s32.totalorder %v815_v59, %v364_v37  ;;  %vm366_vm9 = vcmp.eq.s32.totalorder %v817_v60, %v364_v37 }
  0xe9   :  { %v292_v6 = vadd.s32 %v290_v4, %v282_v2  ;;  %v293_v7 = vadd.s32 %v291_v5, %v283_v3  ;;  %v370_v52 = vsel %vm365_vm8, %v369_v45, 0  ;;  %v371_v54 = vsel %vm366_vm9, %v369_v45, 0  ;;  %v399_v3 = vpop.permute.xlu0 %398 }
  0xea   :  { %v404_v4 = vadd.s32 264, %v808_v53  ;;  %v464_v37 = vadd.s32 312, %v808_v53 }
  0xec   :  { %v299_v8 = vpop.permute.xlu1 %298 }
  0xed   :  { %v300_v11 = vsel %vm295_vm10, %v299_v8, 0  ;;  %v301_v12 = vsel %vm296_vm11, %v299_v8, 0  ;;  %vm375_vm10 = vcmp.eq.s32.totalorder %v815_v59, %v374_v46  ;;  %vm376_vm11 = vcmp.eq.s32.totalorder %v817_v60, %v374_v46 }
  0xee   :  { %v302_v13 = vadd.s32 %v300_v11, %v292_v6  ;;  %v303_v14 = vadd.s32 %v301_v12, %v293_v7  ;;  %v414_v11 = vadd.s32 272, %v808_v53 }
  0xf0   :  { %v312_v20 = vadd.s32 %v310_v15, %v302_v13  ;;  %v313_v21 = vadd.s32 %v311_v16, %v303_v14  ;;  %v424_v13 = vadd.s32 280, %v808_v53  ;;  %vm415_vm2 = vcmp.eq.s32.totalorder %v815_v59, %v414_v11 }
  0xf1   :  { %v319_v18 = vpop.permute.xlu1 %318  ;;  %vm416_vm3 = vcmp.eq.s32.totalorder %v817_v60, %v414_v11 }
  0xf2   :  { %v320_v22 = vsel %vm315_vm14, %v319_v18, 0  ;;  %v321_v23 = vsel %vm316_vm15, %v319_v18, 0  ;;  %vm395_vm14 = vcmp.eq.s32.totalorder %v815_v59, %v394_v57  ;;  %vm396_vm15 = vcmp.eq.s32.totalorder %v817_v60, %v394_v57 }
  0xf3   :  { %v322_v24 = vadd.s32 %v320_v22, %v312_v20  ;;  %v323_v25 = vadd.s32 %v321_v23, %v313_v21  ;;  %v400_v9 = vsel %vm395_vm14, %v399_v3, 0  ;;  %v401_v10 = vsel %vm396_vm15, %v399_v3, 0  ;;  %v429_v21 = vpop.permute.xlu0 %428 }
  0xf4   :  { %v434_v22 = vadd.s32 288, %v808_v53  ;;  %vm505_vm14 = vcmp.lt.s32.totalorder %v66_v50, 256 }
  0xf6   :  { %v329_v26 = vpop.permute.xlu1 %328 }
  0xf7   :  { %v330_v29 = vsel %vm325_vm0, %v329_v26, 0  ;;  %v331_v30 = vsel %vm326_vm1, %v329_v26, 0  ;;  %vm405_vm0 = vcmp.eq.s32.totalorder %v815_v59, %v404_v4  ;;  %vm406_vm1 = vcmp.eq.s32.totalorder %v817_v60, %v404_v4 }
  0xf8   :  { %v332_v31 = vadd.s32 %v330_v29, %v322_v24  ;;  %v333_v32 = vadd.s32 %v331_v30, %v323_v25  ;;  %v444_v29 = vadd.s32 296, %v808_v53  ;;  %v454_v30 = vadd.s32 304, %v808_v53 }
  0xfa   :  { %v342_v38 = vadd.s32 %v340_v33, %v332_v31  ;;  %v343_v39 = vadd.s32 %v341_v34, %v333_v32  ;;  %vm445_vm8 = vcmp.eq.s32.totalorder %v815_v59, %v444_v29  ;;  %vm446_vm9 = vcmp.eq.s32.totalorder %v817_v60, %v444_v29 }
  0xfb   :  { %v349_v36 = vpop.permute.xlu1 %348 }
  0xfc   :  { %v350_v40 = vsel %vm345_vm4, %v349_v36, 0  ;;  %v351_v41 = vsel %vm346_vm5, %v349_v36, 0  ;;  %vm425_vm4 = vcmp.eq.s32.totalorder %v815_v59, %v424_v13  ;;  %vm426_vm5 = vcmp.eq.s32.totalorder %v817_v60, %v424_v13  ;;  %v459_v36 = vpop.permute.xlu0 %458 }
  0xfd   :  { %v352_v42 = vadd.s32 %v350_v40, %v342_v38  ;;  %v353_v43 = vadd.s32 %v351_v41, %v343_v39  ;;  %v430_v27 = vsel %vm425_vm4, %v429_v21, 0  ;;  %v431_v28 = vsel %vm426_vm5, %v429_v21, 0 }
 0x100   :  { %v359_v44 = vpop.permute.xlu1 %358 }
 0x101   :  { %v360_v47 = vsel %vm355_vm6, %v359_v44, 0  ;;  %v361_v48 = vsel %vm356_vm7, %v359_v44, 0  ;;  %vm435_vm6 = vcmp.eq.s32.totalorder %v815_v59, %v434_v22  ;;  %vm436_vm7 = vcmp.eq.s32.totalorder %v817_v60, %v434_v22 }
 0x102   :  { %v362_v49 = vadd.s32 %v360_v47, %v352_v42  ;;  %v363_v51 = vadd.s32 %v361_v48, %v353_v43 }
 0x104   :  { %v372_v58 = vadd.s32 %v370_v52, %v362_v49  ;;  %v373_v61 = vadd.s32 %v371_v54, %v363_v51 }
 0x105   :  { %v379_v56 = vpop.permute.xlu1 %378 }
 0x106   :  { %v380_v62 = vsel %vm375_vm10, %v379_v56, 0  ;;  %v381_v63 = vsel %vm376_vm11, %v379_v56, 0  ;;  %vm455_vm10 = vcmp.eq.s32.totalorder %v815_v59, %v454_v30  ;;  %vm456_vm11 = vcmp.eq.s32.totalorder %v817_v60, %v454_v30 }
 0x107   :  { %v382_v0 = vadd.s32 %v380_v62, %v372_v58  ;;  %v383_v1 = vadd.s32 %v381_v63, %v373_v61  ;;  %v460_v43 = vsel %vm455_vm10, %v459_v36, 0  ;;  %v461_v44 = vsel %vm456_vm11, %v459_v36, 0 }
 0x10a   :  { %v389_v2 = vpop.permute.xlu1 %388 }
 0x10b   :  { %v390_v5 = vsel %vm385_vm12, %v389_v2, 0  ;;  %v391_v6 = vsel %vm386_vm13, %v389_v2, 0  ;;  %vm465_vm12 = vcmp.eq.s32.totalorder %v815_v59, %v464_v37  ;;  %vm466_vm13 = vcmp.eq.s32.totalorder %v817_v60, %v464_v37 }
 0x10c   :  { %v392_v7 = vadd.s32 %v390_v5, %v382_v0  ;;  %v393_v8 = vadd.s32 %v391_v6, %v383_v1  ;;  %v725_v0 = vmov 1966171168  }
 0x10d   :  { %v490_v1 = vunpack.c.l.s4 %v725_v0 }
 0x10e   :  { %v402_v14 = vadd.s32 %v400_v9, %v392_v7  ;;  %v403_v15 = vadd.s32 %v401_v10, %v393_v8 }
 0x10f   :  { %v409_v12 = vpop.permute.xlu1 %408  ;;  %v491_v60 = vunpack.c.0.s8 %v490_v1 }
 0x110   :  { %v410_v16 = vsel %vm405_vm0, %v409_v12, 0  ;;  %v411_v17 = vsel %vm406_vm1, %v409_v12, 0 }
 0x111   :  { %v412_v18 = vadd.s32 %v410_v16, %v402_v14  ;;  %v413_v19 = vadd.s32 %v411_v17, %v403_v15  ;;  %v494_v9 = vsub.s32 %v491_v60, %v808_v53 }
 0x114   :  { %v419_v20 = vpop.permute.xlu1 %418 }
 0x115   :  { %v420_v23 = vsel %vm415_vm2, %v419_v20, 0  ;;  %v421_v24 = vsel %vm416_vm3, %v419_v20, 0 }
 0x116   :  { %v422_v25 = vadd.s32 %v420_v23, %v412_v18  ;;  %v423_v26 = vadd.s32 %v421_v24, %v413_v19 }
 0x118   :  { %v432_v32 = vadd.s32 %v430_v27, %v422_v25  ;;  %v433_v33 = vadd.s32 %v431_v28, %v423_v26 }
 0x119   :  { %v439_v31 = vpop.permute.xlu1 %438 }
 0x11a   :  { %v440_v34 = vsel %vm435_vm6, %v439_v31, 0  ;;  %v441_v35 = vsel %vm436_vm7, %v439_v31, 0 }
 0x11b   :  { %v442_v38 = vadd.s32 %v440_v34, %v432_v32  ;;  %v443_v39 = vadd.s32 %v441_v35, %v433_v33 }
 0x11e   :  { %v449_v40 = vpop.permute.xlu1 %448 }
 0x11f   :  { %v450_v41 = vsel %vm445_vm8, %v449_v40, 0  ;;  %v451_v42 = vsel %vm446_vm9, %v449_v40, 0 }
 0x120   :  { %v452_v45 = vadd.s32 %v450_v41, %v442_v38  ;;  %v453_v46 = vadd.s32 %v451_v42, %v443_v39 }
 0x122   :  { %v462_v47 = vadd.s32 %v460_v43, %v452_v45  ;;  %v463_v48 = vadd.s32 %v461_v44, %v453_v46 }
 0x123   :  { %v469_v49 = vpop.permute.xlu1 %468 }
 0x124   :  { %v470_v51 = vsel %vm465_vm12, %v469_v49, 0  ;;  %v471_v52 = vsel %vm466_vm13, %v469_v49, 0 }
 0x125   :  { %v472_v54 = vadd.s32 %v470_v51, %v462_v47  ;;  %v473_v55 = vadd.s32 %v471_v52, %v463_v48 }
 0x127   :  { %v474_v56 = vrot.slane %v472_v54, 4  ;;  %v480_v57 = vrot.slane %v473_v55, 4 }
 0x129   :  { %v475_v58 = vadd.s32 %v474_v56, %v472_v54  ;;  %v481_v61 = vadd.s32 %v480_v57, %v473_v55 }
 0x12b   :  { %v476_v62 = vrot.slane %v475_v58, 2  ;;  %v482_v63 = vrot.slane %v481_v61, 2 }
 0x12d   :  { %v477_v2 = vadd.s32 %v476_v62, %v475_v58  ;;  %v483_v3 = vadd.s32 %v482_v63, %v481_v61 }
 0x12f   :  { %v478_v59 = vrot.slane %v477_v2, 1  ;;  %v484_v4 = vrot.slane %v483_v3, 1 }
 0x131   :  { %v479_v5 = vadd.s32 %v478_v59, %v477_v2  ;;  %v485_v6 = vadd.s32 %v484_v4, %v483_v3 }
 0x133   :  { %v524_v7 = vadd.s32 4294967295, %v479_v5  ;;  %v525_v8 = vadd.s32 4294967295, %v485_v6 }
 0x135   :  { %v488_v10 = vcombine.low %v524_v7, %v525_v8 }
 0x137   :  { %v495_v11 = vrot.slane %v488_v10, %v494_v9 }
 0x139   :  { %v502_v12 = vrot.slane %v495_v11, %v494_v9 }
 0x13b   :  { %507 = vst.msk [vmem:[#allocation7] sm:$0x3] %vm505_vm14, %v502_v12 }
 0x13c   :  { %666 = shalt.err (!%p663_p6)
}
 0x13d   :  { %s667_s8 = scalar_lea.hbm %s956_s2, 32 }
 0x13e   :  { %p668_p7 = scmp.ne.s32.totalorder %s956_s2, %s667_s8  ;;  %p671_p8 = scmp.lt.u32.totalorder %s667_s8, %s956_s2 }
 0x140   :  { %p673_p9 = pnand %p671_p8, %p668_p7 }
 0x142   :  { %676 = shalt.err (!%p673_p9)
}
 0x143   :  { %517 = dma.vmem_to_hbm [thread:$0]  %s515_s4, 32, %s956_s2, [#allocation4]  }
 0x144   :  { %681 = dma.done.wait [#allocation4], 32  }
 0x145   :  { %682 = vsyncadd [#allocation4], 4294967264 }
 0x146   :  { %521 = vsyncpa [#allocation3], 1 }
 0x147   :  { %522 = vsyncpa [#allocation6], 1 }
 0x148   :  { %523 = vsyncpa [#allocation4], 1 }

</bundles_post_ra>
